<compile_context>
chip_gen: v7x
topology: tpu7x:2x2x1
jax: 0.10.0
libtpu: 0.0.40
codegen_flags: <defaults>
</compile_context>

<pallas_src>
import functools

import jax
import jax.numpy as jnp
from jax import lax
from jax.experimental import pallas as pl
from jax.experimental.pallas import tpu as pltpu


_VMEM_SPEC = pl.BlockSpec(memory_space=pltpu.MemorySpace.VMEM)


# ----------------------------------------------------------------------------
# Fused Pallas kernel: dual-GRU recurrence + complex combine + FC + Tanh
# ----------------------------------------------------------------------------
def fused_complex_gru_kernel(x_ref, wih_t_ref, whh_t_ref, bgi_ref, bhn_ref,
                             wfc_t_ref, bfc_ref, out_ref, gi_ref, fcin_ref,
                             *, batch):
    """All four GRU streams + complex FC head in one kernel.

    Gate-column order everywhere: [r_real | r_imag | z_real | z_imag | n_real | n_imag].

    x_ref:     [T*2B, I]   time-major, rows t*2B+[0:B]=real input, +[B:2B]=imag input
    wih_t_ref: [I, 6H]     gate-interleaved [W_ih_real^T / W_ih_imag^T]
    whh_t_ref: [2H, 6H]    per-gate block-diag(W_hh_real^T, W_hh_imag^T)
    bgi_ref:   [1, 6H]     r,z gates: b_ih+b_hh ; n gate: b_in only
    bhn_ref:   [1, 2H]     n gate: [b_hn_real | b_hn_imag]
    wfc_t_ref: [2H, 2O]    block-diag(W_fc_real^T, W_fc_imag^T)
    bfc_ref:   [1, 2O]     [b_fc_real | b_fc_imag]
    out_ref:   [T*B, 2O]   tanh(FC(complex-combined hidden)), cols [0:O]=real, [O:2O]=imag
    gi_ref:    [T*2B, 6H]  VMEM scratch (hoisted input projection)
    fcin_ref:  [T*B, 2H]   VMEM scratch (combined FC input, [real_h | imag_h])
    """
    two_b = 2 * batch
    T = x_ref.shape[0] // two_b
    h2 = whh_t_ref.shape[0]          # 2H
    H = h2 // 2
    h4 = 2 * h2                      # 4H

    # 1) Hoisted input projection: all timesteps x both GRUs x all gates in one MXU op.
    gi_ref[...] = (jnp.dot(x_ref[...], wih_t_ref[...],
                           preferred_element_type=jnp.float32) + bgi_ref[...])

    whh_t = whh_t_ref[...]
    # Hoist the (n-gate only) recurrent-bias broadcast out of the loop.
    bhn = jnp.broadcast_to(bhn_ref[...], (two_b, h2))

    # 2) Serial recurrence, fully unrolled (T compile-time constant) with static slices.
    h = jnp.zeros((two_b, h2), jnp.float32)
    for t in range(T):
        gi = gi_ref[t * two_b:(t + 1) * two_b, :]                      # [2B, 6H]
        gh = jnp.dot(h, whh_t, preferred_element_type=jnp.float32)     # [2B, 6H]  (serial path)

        # Both GRUs' gates in one shot (gate-interleaved layout).
        r = jax.nn.sigmoid(gi[:, 0:h2] + gh[:, 0:h2])
        z = jax.nn.sigmoid(gi[:, h2:h4] + gh[:, h2:h4])
        n = jnp.tanh(gi[:, h4:] + r * (gh[:, h4:] + bhn))
        h = n + z * (h - n)                                            # (1-z)*n + z*h

        # Complex combine per step (pure VPU work, hides under the serial matmul):
        #   r2r = h[0:B, 0:H], r2i = h[0:B, H:2H], i2r = h[B:2B, 0:H], i2i = h[B:2B, H:2H]
        real_h = h[0:batch, 0:H] - h[batch:two_b, H:h2]                # r2r - i2i
        imag_h = h[batch:two_b, 0:H] + h[0:batch, H:h2]                # i2r + r2i
        fcin_ref[t * batch:(t + 1) * batch, :] = jnp.concatenate(
            [real_h, imag_h], axis=1)                                  # [B, 2H]

    # 3) Fused FC (block-diag real/imag) + Tanh epilogue: one MXU op over all T*B rows.
    out_ref[...] = jnp.tanh(
        jnp.dot(fcin_ref[...], wfc_t_ref[...], preferred_element_type=jnp.float32)
        + bfc_ref[...])


# ----------------------------------------------------------------------------
# Wrapper (parameter folding + single pallas_call)
# ----------------------------------------------------------------------------
def _block_diag(a, b):
    za = jnp.zeros((a.shape[0], b.shape[1]), a.dtype)
    zb = jnp.zeros((b.shape[0], a.shape[1]), b.dtype)
    return jnp.concatenate([jnp.concatenate([a, za], axis=1),
                            jnp.concatenate([zb, b], axis=1)], axis=0)


def _interleave_gate_cols(wr_t, wi_t, H):
    # [*, 3H] each (cols r|z|n) -> [*, 6H] cols [r_r|r_i|z_r|z_i|n_r|n_i]
    cols = []
    for g in range(3):
        cols.append(wr_t[:, g * H:(g + 1) * H])
        cols.append(wi_t[:, g * H:(g + 1) * H])
    return jnp.concatenate(cols, axis=1)


def _interleave_gate_blockdiag(whh_r_t, whh_i_t, H):
    # [H, 3H] each -> [2H, 6H]: per gate, block_diag(real, imag), concat over gates.
    blocks = []
    for g in range(3):
        blocks.append(_block_diag(whh_r_t[:, g * H:(g + 1) * H],
                                  whh_i_t[:, g * H:(g + 1) * H]))
    return jnp.concatenate(blocks, axis=1)


def complex_sequence_model_forward(x, params):
    """x: [B, 2*input_size, T] -> o: [B, 2*output_size, T] (matches PyTorch forward)."""
    B, C2, T = x.shape
    I = C2 // 2
    wih_r, whh_r, bih_r, bhh_r = params["real_gru"]
    wih_i, whh_i, bih_i, bhh_i = params["imag_gru"]
    H = whh_r.shape[1]
    O = params["real_fc_w"].shape[0]

    # NCL -> time-major with real/imag stacked on the batch axis, flattened to 2D.
    real_tbi = jnp.transpose(x[:, :I, :], (2, 0, 1))                    # [T, B, I]
    imag_tbi = jnp.transpose(x[:, I:, :], (2, 0, 1))
    x2d = jnp.concatenate([real_tbi, imag_tbi], axis=1).reshape(T * 2 * B, I)

    # Fuse the two GRUs: gate-interleaved columns, per-gate block-diag recurrence.
    wih_cat_t = _interleave_gate_cols(wih_r.T, wih_i.T, H)              # [I, 6H]
    whh_bd_t = _interleave_gate_blockdiag(whh_r.T, whh_i.T, H)          # [2H, 6H]
    bgi = jnp.concatenate([
        bih_r[0:H] + bhh_r[0:H],            bih_i[0:H] + bhh_i[0:H],
        bih_r[H:2 * H] + bhh_r[H:2 * H],    bih_i[H:2 * H] + bhh_i[H:2 * H],
        bih_r[2 * H:3 * H],                 bih_i[2 * H:3 * H],
    ]).reshape(1, 6 * H)
    bhn = jnp.concatenate([bhh_r[2 * H:3 * H], bhh_i[2 * H:3 * H]]).reshape(1, 2 * H)

    # Fuse the two output FC layers (block-diag) so cols [0:O]=real, [O:2O]=imag.
    wfc_bd_t = _block_diag(params["real_fc_w"].T, params["imag_fc_w"].T)  # [2H, 2O]
    bfc = jnp.concatenate([params["real_fc_b"], params["imag_fc_b"]]).reshape(1, 2 * O)

    out2d = pl.pallas_call(
        functools.partial(fused_complex_gru_kernel, batch=B),
        out_shape=jax.ShapeDtypeStruct((T * B, 2 * O), jnp.float32),
        in_specs=[_VMEM_SPEC] * 7,
        out_specs=_VMEM_SPEC,
        scratch_shapes=[
            pltpu.VMEM((T * 2 * B, 6 * H), jnp.float32),   # hoisted input projection
            pltpu.VMEM((T * B, 2 * H), jnp.float32),       # combined FC input
        ],
    )(x2d, wih_cat_t, whh_bd_t, bgi, bhn, wfc_bd_t, bfc)

    # [T*B, 2O] -> [B, 2O, T]; channel order [real || imag] matches torch.cat.
    return jnp.transpose(out2d.reshape(T, B, 2 * O), (1, 2, 0))


# ----------------------------------------------------------------------------
# Pure-JAX reference (for correctness check)
# ----------------------------------------------------------------------------
def gru_ref(x_tbi, wih, whh, bih, bhh):
    H = whh.shape[1]
    B = x_tbi.shape[1]

    def cell(h, x_t):
        gi = x_t @ wih.T + bih
        gh = h @ whh.T + bhh
        r = jax.nn.sigmoid(gi[:, :H] + gh[:, :H])
        z = jax.nn.sigmoid(gi[:, H:2 * H] + gh[:, H:2 * H])
        n = jnp.tanh(gi[:, 2 * H:] + r * gh[:, 2 * H:])
        h_new = (1.0 - z) * n + z * h
        return h_new, h_new

    h0 = jnp.zeros((B, H), jnp.float32)
    _, ys = lax.scan(cell, h0, x_tbi)
    return ys                                            # [T, B, H]


def forward_ref(x, params):
    B, C2, T = x.shape
    I = C2 // 2
    real_tbi = jnp.transpose(x[:, :I, :], (2, 0, 1))
    imag_tbi = jnp.transpose(x[:, I:, :], (2, 0, 1))
    rg, ig = params["real_gru"], params["imag_gru"]
    r2r = gru_ref(real_tbi, *rg)
    r2i = gru_ref(real_tbi, *ig)
    i2r = gru_ref(imag_tbi, *rg)
    i2i = gru_ref(imag_tbi, *ig)
    real_out = jnp.tanh((r2r - i2i) @ params["real_fc_w"].T + params["real_fc_b"])
    imag_out = jnp.tanh((i2r + r2i) @ params["imag_fc_w"].T + params["imag_fc_b"])
    real_ncl = jnp.transpose(real_out, (1, 2, 0))
    imag_ncl = jnp.transpose(imag_out, (1, 2, 0))
    return jnp.concatenate([real_ncl, imag_ncl], axis=1)


# ----------------------------------------------------------------------------
# Deterministic parameter init (PyTorch-style U(-1/sqrt(H), 1/sqrt(H)))
# ----------------------------------------------------------------------------
def init_params(key, input_size, hidden_size, output_size):
    k = 1.0 / jnp.sqrt(hidden_size)
    keys = jax.random.split(key, 12)

    def u(kk, shape):
        return jax.random.uniform(kk, shape, jnp.float32, -k, k)

    def gru_params(k0, k1, k2, k3):
        return (u(k0, (3 * hidden_size, input_size)),   # W_ih
                u(k1, (3 * hidden_size, hidden_size)),  # W_hh
                u(k2, (3 * hidden_size,)),              # b_ih
                u(k3, (3 * hidden_size,)))              # b_hh

    return {
        "real_gru": gru_params(*keys[0:4]),
        "imag_gru": gru_params(*keys[4:8]),
        "real_fc_w": u(keys[8], (output_size, hidden_size)),
        "real_fc_b": u(keys[9], (output_size,)),
        "imag_fc_w": u(keys[10], (output_size, hidden_size)),
        "imag_fc_b": u(keys[11], (output_size,)),
    }


if __name__ == "__main__":
    B, INPUT, OUTPUT, HIDDEN, T = 2, 16, 16, 32, 8

    key = jax.random.PRNGKey(0)
    k_params, k_x = jax.random.split(key)
    params = init_params(k_params, INPUT, HIDDEN, OUTPUT)
    x = jax.random.normal(k_x, (B, 2 * INPUT, T), dtype=jnp.float32)

    fwd = jax.jit(lambda xx: complex_sequence_model_forward(xx, params))
    out = jax.block_until_ready(fwd(x))

    ref = forward_ref(x, params)
    assert out.shape == (B, 2 * OUTPUT, T), out.shape
    assert jnp.allclose(out, ref, atol=2e-3, rtol=2e-3), float(jnp.max(jnp.abs(out - ref)))

    print("KERNEL_OK")
</pallas_src>

<mosaic_0001>
module attributes {stable_mosaic.version = 11 : i64} {
  func.func @fused_complex_gru_kernel(%arg0: memref<32x16xf32, #tpu.memory_space<vmem>>, %arg1: memref<16x192xf32, #tpu.memory_space<vmem>>, %arg2: memref<64x192xf32, #tpu.memory_space<vmem>>, %arg3: memref<1x192xf32, #tpu.memory_space<vmem>>, %arg4: memref<1x64xf32, #tpu.memory_space<vmem>>, %arg5: memref<64x32xf32, #tpu.memory_space<vmem>>, %arg6: memref<1x32xf32, #tpu.memory_space<vmem>>, %arg7: memref<16x32xf32, #tpu.memory_space<vmem>>, %arg8: memref<32x192xf32, #tpu.memory_space<vmem>>, %arg9: memref<16x64xf32, #tpu.memory_space<vmem>>) attributes {dimension_semantics = [], scalar_prefetch = 0 : i64, scratch_operands = 2 : i64, tpu.core_type = #tpu.core_type<tc>} {
    %c0 = arith.constant 0 : index
    %c0_0 = arith.constant 0 : index
    %0 = vector.load %arg0[%c0, %c0_0] : memref<32x16xf32, #tpu.memory_space<vmem>>, vector<32x16xf32>
    %c0_1 = arith.constant 0 : index
    %c0_2 = arith.constant 0 : index
    %1 = vector.load %arg1[%c0_1, %c0_2] : memref<16x192xf32, #tpu.memory_space<vmem>>, vector<16x192xf32>
    %cst = arith.constant dense<0.000000e+00> : vector<32x192xf32>
    %2 = tpu.matmul %0, %1, %cst {dimension_numbers = #tpu.dot_dimension_numbers<[1], [0], [0], [1], [0, 0, 1, 1], [], []>} : vector<32x16xf32>, vector<16x192xf32>, vector<32x192xf32> -> vector<32x192xf32>
    %c0_3 = arith.constant 0 : index
    %c0_4 = arith.constant 0 : index
    %3 = vector.load %arg3[%c0_3, %c0_4] : memref<1x192xf32, #tpu.memory_space<vmem>>, vector<1x192xf32>
    %4 = vector.broadcast %3 : vector<1x192xf32> to vector<32x192xf32>
    %5 = arith.addf %2, %4 : vector<32x192xf32>
    %c0_5 = arith.constant 0 : index
    %c0_6 = arith.constant 0 : index
    %6 = vector.load %arg8[%c0_5, %c0_6] : memref<32x192xf32, #tpu.memory_space<vmem>>, vector<32x192xf32>
    tpu.vector_store %arg8[%c0_5, %c0_6], %5 {strides = array<i32>} : memref<32x192xf32, #tpu.memory_space<vmem>>, vector<32x192xf32>,
    %c0_7 = arith.constant 0 : index
    %c0_8 = arith.constant 0 : index
    %7 = vector.load %arg2[%c0_7, %c0_8] : memref<64x192xf32, #tpu.memory_space<vmem>>, vector<64x192xf32>
    %c0_9 = arith.constant 0 : index
    %c0_10 = arith.constant 0 : index
    %8 = vector.load %arg4[%c0_9, %c0_10] : memref<1x64xf32, #tpu.memory_space<vmem>>, vector<1x64xf32>
    %9 = vector.shape_cast %8 : vector<1x64xf32> to vector<1x64xf32>
    %10 = vector.broadcast %9 : vector<1x64xf32> to vector<4x64xf32>
    %cst_11 = arith.constant 0.000000e+00 : f32
    %11 = vector.broadcast %cst_11 : f32 to vector<4x64xf32>
    %c0_12 = arith.constant 0 : index
    %c0_13 = arith.constant 0 : index
    %12 = vector.load %arg8[%c0_12, %c0_13] : memref<32x192xf32, #tpu.memory_space<vmem>>, vector<4x192xf32>
    %cst_14 = arith.constant dense<0.000000e+00> : vector<4x192xf32>
    %13 = tpu.matmul %11, %7, %cst_14 {dimension_numbers = #tpu.dot_dimension_numbers<[1], [0], [0], [1], [0, 0, 1, 1], [], []>} : vector<4x64xf32>, vector<64x192xf32>, vector<4x192xf32> -> vector<4x192xf32>
    %14 = vector.extract_strided_slice %12 {offsets = [0, 0], sizes = [4, 64], strides = [1, 1]} : vector<4x192xf32> to vector<4x64xf32>
    %15 = vector.extract_strided_slice %13 {offsets = [0, 0], sizes = [4, 64], strides = [1, 1]} : vector<4x192xf32> to vector<4x64xf32>
    %16 = arith.addf %14, %15 : vector<4x64xf32>
    %17 = arith.negf %16 : vector<4x64xf32>
    %18 = math.exp %17 : vector<4x64xf32>
    %cst_15 = arith.constant 1.000000e+00 : f32
    %19 = vector.broadcast %cst_15 : f32 to vector<4x64xf32>
    %20 = arith.addf %19, %18 : vector<4x64xf32>
    %21 = arith.divf %19, %20 : vector<4x64xf32>
    %22 = vector.extract_strided_slice %12 {offsets = [0, 64], sizes = [4, 64], strides = [1, 1]} : vector<4x192xf32> to vector<4x64xf32>
    %23 = vector.extract_strided_slice %13 {offsets = [0, 64], sizes = [4, 64], strides = [1, 1]} : vector<4x192xf32> to vector<4x64xf32>
    %24 = arith.addf %22, %23 : vector<4x64xf32>
    %25 = arith.negf %24 : vector<4x64xf32>
    %26 = math.exp %25 : vector<4x64xf32>
    %cst_16 = arith.constant 1.000000e+00 : f32
    %27 = vector.broadcast %cst_16 : f32 to vector<4x64xf32>
    %28 = arith.addf %27, %26 : vector<4x64xf32>
    %29 = arith.divf %27, %28 : vector<4x64xf32>
    %30 = vector.extract_strided_slice %12 {offsets = [0, 128], sizes = [4, 64], strides = [1, 1]} : vector<4x192xf32> to vector<4x64xf32>
    %31 = vector.extract_strided_slice %13 {offsets = [0, 128], sizes = [4, 64], strides = [1, 1]} : vector<4x192xf32> to vector<4x64xf32>
    %32 = arith.addf %31, %10 : vector<4x64xf32>
    %33 = arith.mulf %21, %32 : vector<4x64xf32>
    %34 = arith.addf %30, %33 : vector<4x64xf32>
    %35 = math.tanh %34 : vector<4x64xf32>
    %36 = arith.subf %11, %35 : vector<4x64xf32>
    %37 = arith.mulf %29, %36 : vector<4x64xf32>
    %38 = arith.addf %35, %37 : vector<4x64xf32>
    %39 = vector.extract_strided_slice %38 {offsets = [0, 0], sizes = [2, 32], strides = [1, 1]} : vector<4x64xf32> to vector<2x32xf32>
    %40 = vector.extract_strided_slice %38 {offsets = [2, 32], sizes = [2, 32], strides = [1, 1]} : vector<4x64xf32> to vector<2x32xf32>
    %41 = arith.subf %39, %40 : vector<2x32xf32>
    %42 = vector.extract_strided_slice %38 {offsets = [2, 0], sizes = [2, 32], strides = [1, 1]} : vector<4x64xf32> to vector<2x32xf32>
    %43 = vector.extract_strided_slice %38 {offsets = [0, 32], sizes = [2, 32], strides = [1, 1]} : vector<4x64xf32> to vector<2x32xf32>
    %44 = arith.addf %42, %43 : vector<2x32xf32>
    %45 = tpu.concatenate %41, %44 in 1 : vector<2x32xf32>, vector<2x32xf32> -> vector<2x64xf32>
    %c0_17 = arith.constant 0 : index
    %c0_18 = arith.constant 0 : index
    %46 = vector.load %arg9[%c0_17, %c0_18] : memref<16x64xf32, #tpu.memory_space<vmem>>, vector<2x64xf32>
    tpu.vector_store %arg9[%c0_17, %c0_18], %45 {strides = array<i32>} : memref<16x64xf32, #tpu.memory_space<vmem>>, vector<2x64xf32>,
    %c4 = arith.constant 4 : index
    %c0_19 = arith.constant 0 : index
    %47 = vector.load %arg8[%c4, %c0_19] : memref<32x192xf32, #tpu.memory_space<vmem>>, vector<4x192xf32>
    %cst_20 = arith.constant dense<0.000000e+00> : vector<4x192xf32>
    %48 = tpu.matmul %38, %7, %cst_20 {dimension_numbers = #tpu.dot_dimension_numbers<[1], [0], [0], [1], [0, 0, 1, 1], [], []>} : vector<4x64xf32>, vector<64x192xf32>, vector<4x192xf32> -> vector<4x192xf32>
    %49 = vector.extract_strided_slice %47 {offsets = [0, 0], sizes = [4, 64], strides = [1, 1]} : vector<4x192xf32> to vector<4x64xf32>
    %50 = vector.extract_strided_slice %48 {offsets = [0, 0], sizes = [4, 64], strides = [1, 1]} : vector<4x192xf32> to vector<4x64xf32>
    %51 = arith.addf %49, %50 : vector<4x64xf32>
    %52 = arith.negf %51 : vector<4x64xf32>
    %53 = math.exp %52 : vector<4x64xf32>
    %cst_21 = arith.constant 1.000000e+00 : f32
    %54 = vector.broadcast %cst_21 : f32 to vector<4x64xf32>
    %55 = arith.addf %54, %53 : vector<4x64xf32>
    %56 = arith.divf %54, %55 : vector<4x64xf32>
    %57 = vector.extract_strided_slice %47 {offsets = [0, 64], sizes = [4, 64], strides = [1, 1]} : vector<4x192xf32> to vector<4x64xf32>
    %58 = vector.extract_strided_slice %48 {offsets = [0, 64], sizes = [4, 64], strides = [1, 1]} : vector<4x192xf32> to vector<4x64xf32>
    %59 = arith.addf %57, %58 : vector<4x64xf32>
    %60 = arith.negf %59 : vector<4x64xf32>
    %61 = math.exp %60 : vector<4x64xf32>
    %cst_22 = arith.constant 1.000000e+00 : f32
    %62 = vector.broadcast %cst_22 : f32 to vector<4x64xf32>
    %63 = arith.addf %62, %61 : vector<4x64xf32>
    %64 = arith.divf %62, %63 : vector<4x64xf32>
    %65 = vector.extract_strided_slice %47 {offsets = [0, 128], sizes = [4, 64], strides = [1, 1]} : vector<4x192xf32> to vector<4x64xf32>
    %66 = vector.extract_strided_slice %48 {offsets = [0, 128], sizes = [4, 64], strides = [1, 1]} : vector<4x192xf32> to vector<4x64xf32>
    %67 = arith.addf %66, %10 : vector<4x64xf32>
    %68 = arith.mulf %56, %67 : vector<4x64xf32>
    %69 = arith.addf %65, %68 : vector<4x64xf32>
    %70 = math.tanh %69 : vector<4x64xf32>
    %71 = arith.subf %38, %70 : vector<4x64xf32>
    %72 = arith.mulf %64, %71 : vector<4x64xf32>
    %73 = arith.addf %70, %72 : vector<4x64xf32>
    %74 = vector.extract_strided_slice %73 {offsets = [0, 0], sizes = [2, 32], strides = [1, 1]} : vector<4x64xf32> to vector<2x32xf32>
    %75 = vector.extract_strided_slice %73 {offsets = [2, 32], sizes = [2, 32], strides = [1, 1]} : vector<4x64xf32> to vector<2x32xf32>
    %76 = arith.subf %74, %75 : vector<2x32xf32>
    %77 = vector.extract_strided_slice %73 {offsets = [2, 0], sizes = [2, 32], strides = [1, 1]} : vector<4x64xf32> to vector<2x32xf32>
    %78 = vector.extract_strided_slice %73 {offsets = [0, 32], sizes = [2, 32], strides = [1, 1]} : vector<4x64xf32> to vector<2x32xf32>
    %79 = arith.addf %77, %78 : vector<2x32xf32>
    %80 = tpu.concatenate %76, %79 in 1 : vector<2x32xf32>, vector<2x32xf32> -> vector<2x64xf32>
    %c2 = arith.constant 2 : index
    %c0_23 = arith.constant 0 : index
    %81 = vector.load %arg9[%c2, %c0_23] : memref<16x64xf32, #tpu.memory_space<vmem>>, vector<2x64xf32>
    tpu.vector_store %arg9[%c2, %c0_23], %80 {strides = array<i32>} : memref<16x64xf32, #tpu.memory_space<vmem>>, vector<2x64xf32>,
    %c8 = arith.constant 8 : index
    %c0_24 = arith.constant 0 : index
    %82 = vector.load %arg8[%c8, %c0_24] : memref<32x192xf32, #tpu.memory_space<vmem>>, vector<4x192xf32>
    %cst_25 = arith.constant dense<0.000000e+00> : vector<4x192xf32>
    %83 = tpu.matmul %73, %7, %cst_25 {dimension_numbers = #tpu.dot_dimension_numbers<[1], [0], [0], [1], [0, 0, 1, 1], [], []>} : vector<4x64xf32>, vector<64x192xf32>, vector<4x192xf32> -> vector<4x192xf32>
    %84 = vector.extract_strided_slice %82 {offsets = [0, 0], sizes = [4, 64], strides = [1, 1]} : vector<4x192xf32> to vector<4x64xf32>
    %85 = vector.extract_strided_slice %83 {offsets = [0, 0], sizes = [4, 64], strides = [1, 1]} : vector<4x192xf32> to vector<4x64xf32>
    %86 = arith.addf %84, %85 : vector<4x64xf32>
    %87 = arith.negf %86 : vector<4x64xf32>
    %88 = math.exp %87 : vector<4x64xf32>
    %cst_26 = arith.constant 1.000000e+00 : f32
    %89 = vector.broadcast %cst_26 : f32 to vector<4x64xf32>
    %90 = arith.addf %89, %88 : vector<4x64xf32>
    %91 = arith.divf %89, %90 : vector<4x64xf32>
    %92 = vector.extract_strided_slice %82 {offsets = [0, 64], sizes = [4, 64], strides = [1, 1]} : vector<4x192xf32> to vector<4x64xf32>
    %93 = vector.extract_strided_slice %83 {offsets = [0, 64], sizes = [4, 64], strides = [1, 1]} : vector<4x192xf32> to vector<4x64xf32>
    %94 = arith.addf %92, %93 : vector<4x64xf32>
    %95 = arith.negf %94 : vector<4x64xf32>
    %96 = math.exp %95 : vector<4x64xf32>
    %cst_27 = arith.constant 1.000000e+00 : f32
    %97 = vector.broadcast %cst_27 : f32 to vector<4x64xf32>
    %98 = arith.addf %97, %96 : vector<4x64xf32>
    %99 = arith.divf %97, %98 : vector<4x64xf32>
    %100 = vector.extract_strided_slice %82 {offsets = [0, 128], sizes = [4, 64], strides = [1, 1]} : vector<4x192xf32> to vector<4x64xf32>
    %101 = vector.extract_strided_slice %83 {offsets = [0, 128], sizes = [4, 64], strides = [1, 1]} : vector<4x192xf32> to vector<4x64xf32>
    %102 = arith.addf %101, %10 : vector<4x64xf32>
    %103 = arith.mulf %91, %102 : vector<4x64xf32>
    %104 = arith.addf %100, %103 : vector<4x64xf32>
    %105 = math.tanh %104 : vector<4x64xf32>
    %106 = arith.subf %73, %105 : vector<4x64xf32>
    %107 = arith.mulf %99, %106 : vector<4x64xf32>
    %108 = arith.addf %105, %107 : vector<4x64xf32>
    %109 = vector.extract_strided_slice %108 {offsets = [0, 0], sizes = [2, 32], strides = [1, 1]} : vector<4x64xf32> to vector<2x32xf32>
    %110 = vector.extract_strided_slice %108 {offsets = [2, 32], sizes = [2, 32], strides = [1, 1]} : vector<4x64xf32> to vector<2x32xf32>
    %111 = arith.subf %109, %110 : vector<2x32xf32>
    %112 = vector.extract_strided_slice %108 {offsets = [2, 0], sizes = [2, 32], strides = [1, 1]} : vector<4x64xf32> to vector<2x32xf32>
    %113 = vector.extract_strided_slice %108 {offsets = [0, 32], sizes = [2, 32], strides = [1, 1]} : vector<4x64xf32> to vector<2x32xf32>
    %114 = arith.addf %112, %113 : vector<2x32xf32>
    %115 = tpu.concatenate %111, %114 in 1 : vector<2x32xf32>, vector<2x32xf32> -> vector<2x64xf32>
    %c4_28 = arith.constant 4 : index
    %c0_29 = arith.constant 0 : index
    %116 = vector.load %arg9[%c4_28, %c0_29] : memref<16x64xf32, #tpu.memory_space<vmem>>, vector<2x64xf32>
    tpu.vector_store %arg9[%c4_28, %c0_29], %115 {strides = array<i32>} : memref<16x64xf32, #tpu.memory_space<vmem>>, vector<2x64xf32>,
    %c12 = arith.constant 12 : index
    %c0_30 = arith.constant 0 : index
    %117 = vector.load %arg8[%c12, %c0_30] : memref<32x192xf32, #tpu.memory_space<vmem>>, vector<4x192xf32>
    %cst_31 = arith.constant dense<0.000000e+00> : vector<4x192xf32>
    %118 = tpu.matmul %108, %7, %cst_31 {dimension_numbers = #tpu.dot_dimension_numbers<[1], [0], [0], [1], [0, 0, 1, 1], [], []>} : vector<4x64xf32>, vector<64x192xf32>, vector<4x192xf32> -> vector<4x192xf32>
    %119 = vector.extract_strided_slice %117 {offsets = [0, 0], sizes = [4, 64], strides = [1, 1]} : vector<4x192xf32> to vector<4x64xf32>
    %120 = vector.extract_strided_slice %118 {offsets = [0, 0], sizes = [4, 64], strides = [1, 1]} : vector<4x192xf32> to vector<4x64xf32>
    %121 = arith.addf %119, %120 : vector<4x64xf32>
    %122 = arith.negf %121 : vector<4x64xf32>
    %123 = math.exp %122 : vector<4x64xf32>
    %cst_32 = arith.constant 1.000000e+00 : f32
    %124 = vector.broadcast %cst_32 : f32 to vector<4x64xf32>
    %125 = arith.addf %124, %123 : vector<4x64xf32>
    %126 = arith.divf %124, %125 : vector<4x64xf32>
    %127 = vector.extract_strided_slice %117 {offsets = [0, 64], sizes = [4, 64], strides = [1, 1]} : vector<4x192xf32> to vector<4x64xf32>
    %128 = vector.extract_strided_slice %118 {offsets = [0, 64], sizes = [4, 64], strides = [1, 1]} : vector<4x192xf32> to vector<4x64xf32>
    %129 = arith.addf %127, %128 : vector<4x64xf32>
    %130 = arith.negf %129 : vector<4x64xf32>
    %131 = math.exp %130 : vector<4x64xf32>
    %cst_33 = arith.constant 1.000000e+00 : f32
    %132 = vector.broadcast %cst_33 : f32 to vector<4x64xf32>
    %133 = arith.addf %132, %131 : vector<4x64xf32>
    %134 = arith.divf %132, %133 : vector<4x64xf32>
    %135 = vector.extract_strided_slice %117 {offsets = [0, 128], sizes = [4, 64], strides = [1, 1]} : vector<4x192xf32> to vector<4x64xf32>
    %136 = vector.extract_strided_slice %118 {offsets = [0, 128], sizes = [4, 64], strides = [1, 1]} : vector<4x192xf32> to vector<4x64xf32>
    %137 = arith.addf %136, %10 : vector<4x64xf32>
    %138 = arith.mulf %126, %137 : vector<4x64xf32>
    %139 = arith.addf %135, %138 : vector<4x64xf32>
    %140 = math.tanh %139 : vector<4x64xf32>
    %141 = arith.subf %108, %140 : vector<4x64xf32>
    %142 = arith.mulf %134, %141 : vector<4x64xf32>
    %143 = arith.addf %140, %142 : vector<4x64xf32>
    %144 = vector.extract_strided_slice %143 {offsets = [0, 0], sizes = [2, 32], strides = [1, 1]} : vector<4x64xf32> to vector<2x32xf32>
    %145 = vector.extract_strided_slice %143 {offsets = [2, 32], sizes = [2, 32], strides = [1, 1]} : vector<4x64xf32> to vector<2x32xf32>
    %146 = arith.subf %144, %145 : vector<2x32xf32>
    %147 = vector.extract_strided_slice %143 {offsets = [2, 0], sizes = [2, 32], strides = [1, 1]} : vector<4x64xf32> to vector<2x32xf32>
    %148 = vector.extract_strided_slice %143 {offsets = [0, 32], sizes = [2, 32], strides = [1, 1]} : vector<4x64xf32> to vector<2x32xf32>
    %149 = arith.addf %147, %148 : vector<2x32xf32>
    %150 = tpu.concatenate %146, %149 in 1 : vector<2x32xf32>, vector<2x32xf32> -> vector<2x64xf32>
    %c6 = arith.constant 6 : index
    %c0_34 = arith.constant 0 : index
    %151 = vector.load %arg9[%c6, %c0_34] : memref<16x64xf32, #tpu.memory_space<vmem>>, vector<2x64xf32>
    tpu.vector_store %arg9[%c6, %c0_34], %150 {strides = array<i32>} : memref<16x64xf32, #tpu.memory_space<vmem>>, vector<2x64xf32>,
    %c16 = arith.constant 16 : index
    %c0_35 = arith.constant 0 : index
    %152 = vector.load %arg8[%c16, %c0_35] : memref<32x192xf32, #tpu.memory_space<vmem>>, vector<4x192xf32>
    %cst_36 = arith.constant dense<0.000000e+00> : vector<4x192xf32>
    %153 = tpu.matmul %143, %7, %cst_36 {dimension_numbers = #tpu.dot_dimension_numbers<[1], [0], [0], [1], [0, 0, 1, 1], [], []>} : vector<4x64xf32>, vector<64x192xf32>, vector<4x192xf32> -> vector<4x192xf32>
    %154 = vector.extract_strided_slice %152 {offsets = [0, 0], sizes = [4, 64], strides = [1, 1]} : vector<4x192xf32> to vector<4x64xf32>
    %155 = vector.extract_strided_slice %153 {offsets = [0, 0], sizes = [4, 64], strides = [1, 1]} : vector<4x192xf32> to vector<4x64xf32>
    %156 = arith.addf %154, %155 : vector<4x64xf32>
    %157 = arith.negf %156 : vector<4x64xf32>
    %158 = math.exp %157 : vector<4x64xf32>
    %cst_37 = arith.constant 1.000000e+00 : f32
    %159 = vector.broadcast %cst_37 : f32 to vector<4x64xf32>
    %160 = arith.addf %159, %158 : vector<4x64xf32>
    %161 = arith.divf %159, %160 : vector<4x64xf32>
    %162 = vector.extract_strided_slice %152 {offsets = [0, 64], sizes = [4, 64], strides = [1, 1]} : vector<4x192xf32> to vector<4x64xf32>
    %163 = vector.extract_strided_slice %153 {offsets = [0, 64], sizes = [4, 64], strides = [1, 1]} : vector<4x192xf32> to vector<4x64xf32>
    %164 = arith.addf %162, %163 : vector<4x64xf32>
    %165 = arith.negf %164 : vector<4x64xf32>
    %166 = math.exp %165 : vector<4x64xf32>
    %cst_38 = arith.constant 1.000000e+00 : f32
    %167 = vector.broadcast %cst_38 : f32 to vector<4x64xf32>
    %168 = arith.addf %167, %166 : vector<4x64xf32>
    %169 = arith.divf %167, %168 : vector<4x64xf32>
    %170 = vector.extract_strided_slice %152 {offsets = [0, 128], sizes = [4, 64], strides = [1, 1]} : vector<4x192xf32> to vector<4x64xf32>
    %171 = vector.extract_strided_slice %153 {offsets = [0, 128], sizes = [4, 64], strides = [1, 1]} : vector<4x192xf32> to vector<4x64xf32>
    %172 = arith.addf %171, %10 : vector<4x64xf32>
    %173 = arith.mulf %161, %172 : vector<4x64xf32>
    %174 = arith.addf %170, %173 : vector<4x64xf32>
    %175 = math.tanh %174 : vector<4x64xf32>
    %176 = arith.subf %143, %175 : vector<4x64xf32>
    %177 = arith.mulf %169, %176 : vector<4x64xf32>
    %178 = arith.addf %175, %177 : vector<4x64xf32>
    %179 = vector.extract_strided_slice %178 {offsets = [0, 0], sizes = [2, 32], strides = [1, 1]} : vector<4x64xf32> to vector<2x32xf32>
    %180 = vector.extract_strided_slice %178 {offsets = [2, 32], sizes = [2, 32], strides = [1, 1]} : vector<4x64xf32> to vector<2x32xf32>
    %181 = arith.subf %179, %180 : vector<2x32xf32>
    %182 = vector.extract_strided_slice %178 {offsets = [2, 0], sizes = [2, 32], strides = [1, 1]} : vector<4x64xf32> to vector<2x32xf32>
    %183 = vector.extract_strided_slice %178 {offsets = [0, 32], sizes = [2, 32], strides = [1, 1]} : vector<4x64xf32> to vector<2x32xf32>
    %184 = arith.addf %182, %183 : vector<2x32xf32>
    %185 = tpu.concatenate %181, %184 in 1 : vector<2x32xf32>, vector<2x32xf32> -> vector<2x64xf32>
    %c8_39 = arith.constant 8 : index
    %c0_40 = arith.constant 0 : index
    %186 = vector.load %arg9[%c8_39, %c0_40] : memref<16x64xf32, #tpu.memory_space<vmem>>, vector<2x64xf32>
    tpu.vector_store %arg9[%c8_39, %c0_40], %185 {strides = array<i32>} : memref<16x64xf32, #tpu.memory_space<vmem>>, vector<2x64xf32>,
    %c20 = arith.constant 20 : index
    %c0_41 = arith.constant 0 : index
    %187 = vector.load %arg8[%c20, %c0_41] : memref<32x192xf32, #tpu.memory_space<vmem>>, vector<4x192xf32>
    %cst_42 = arith.constant dense<0.000000e+00> : vector<4x192xf32>
    %188 = tpu.matmul %178, %7, %cst_42 {dimension_numbers = #tpu.dot_dimension_numbers<[1], [0], [0], [1], [0, 0, 1, 1], [], []>} : vector<4x64xf32>, vector<64x192xf32>, vector<4x192xf32> -> vector<4x192xf32>
    %189 = vector.extract_strided_slice %187 {offsets = [0, 0], sizes = [4, 64], strides = [1, 1]} : vector<4x192xf32> to vector<4x64xf32>
    %190 = vector.extract_strided_slice %188 {offsets = [0, 0], sizes = [4, 64], strides = [1, 1]} : vector<4x192xf32> to vector<4x64xf32>
    %191 = arith.addf %189, %190 : vector<4x64xf32>
    %192 = arith.negf %191 : vector<4x64xf32>
    %193 = math.exp %192 : vector<4x64xf32>
    %cst_43 = arith.constant 1.000000e+00 : f32
    %194 = vector.broadcast %cst_43 : f32 to vector<4x64xf32>
    %195 = arith.addf %194, %193 : vector<4x64xf32>
    %196 = arith.divf %194, %195 : vector<4x64xf32>
    %197 = vector.extract_strided_slice %187 {offsets = [0, 64], sizes = [4, 64], strides = [1, 1]} : vector<4x192xf32> to vector<4x64xf32>
    %198 = vector.extract_strided_slice %188 {offsets = [0, 64], sizes = [4, 64], strides = [1, 1]} : vector<4x192xf32> to vector<4x64xf32>
    %199 = arith.addf %197, %198 : vector<4x64xf32>
    %200 = arith.negf %199 : vector<4x64xf32>
    %201 = math.exp %200 : vector<4x64xf32>
    %cst_44 = arith.constant 1.000000e+00 : f32
    %202 = vector.broadcast %cst_44 : f32 to vector<4x64xf32>
    %203 = arith.addf %202, %201 : vector<4x64xf32>
    %204 = arith.divf %202, %203 : vector<4x64xf32>
    %205 = vector.extract_strided_slice %187 {offsets = [0, 128], sizes = [4, 64], strides = [1, 1]} : vector<4x192xf32> to vector<4x64xf32>
    %206 = vector.extract_strided_slice %188 {offsets = [0, 128], sizes = [4, 64], strides = [1, 1]} : vector<4x192xf32> to vector<4x64xf32>
    %207 = arith.addf %206, %10 : vector<4x64xf32>
    %208 = arith.mulf %196, %207 : vector<4x64xf32>
    %209 = arith.addf %205, %208 : vector<4x64xf32>
    %210 = math.tanh %209 : vector<4x64xf32>
    %211 = arith.subf %178, %210 : vector<4x64xf32>
    %212 = arith.mulf %204, %211 : vector<4x64xf32>
    %213 = arith.addf %210, %212 : vector<4x64xf32>
    %214 = vector.extract_strided_slice %213 {offsets = [0, 0], sizes = [2, 32], strides = [1, 1]} : vector<4x64xf32> to vector<2x32xf32>
    %215 = vector.extract_strided_slice %213 {offsets = [2, 32], sizes = [2, 32], strides = [1, 1]} : vector<4x64xf32> to vector<2x32xf32>
    %216 = arith.subf %214, %215 : vector<2x32xf32>
    %217 = vector.extract_strided_slice %213 {offsets = [2, 0], sizes = [2, 32], strides = [1, 1]} : vector<4x64xf32> to vector<2x32xf32>
    %218 = vector.extract_strided_slice %213 {offsets = [0, 32], sizes = [2, 32], strides = [1, 1]} : vector<4x64xf32> to vector<2x32xf32>
    %219 = arith.addf %217, %218 : vector<2x32xf32>
    %220 = tpu.concatenate %216, %219 in 1 : vector<2x32xf32>, vector<2x32xf32> -> vector<2x64xf32>
    %c10 = arith.constant 10 : index
    %c0_45 = arith.constant 0 : index
    %221 = vector.load %arg9[%c10, %c0_45] : memref<16x64xf32, #tpu.memory_space<vmem>>, vector<2x64xf32>
    tpu.vector_store %arg9[%c10, %c0_45], %220 {strides = array<i32>} : memref<16x64xf32, #tpu.memory_space<vmem>>, vector<2x64xf32>,
    %c24 = arith.constant 24 : index
    %c0_46 = arith.constant 0 : index
    %222 = vector.load %arg8[%c24, %c0_46] : memref<32x192xf32, #tpu.memory_space<vmem>>, vector<4x192xf32>
    %cst_47 = arith.constant dense<0.000000e+00> : vector<4x192xf32>
    %223 = tpu.matmul %213, %7, %cst_47 {dimension_numbers = #tpu.dot_dimension_numbers<[1], [0], [0], [1], [0, 0, 1, 1], [], []>} : vector<4x64xf32>, vector<64x192xf32>, vector<4x192xf32> -> vector<4x192xf32>
    %224 = vector.extract_strided_slice %222 {offsets = [0, 0], sizes = [4, 64], strides = [1, 1]} : vector<4x192xf32> to vector<4x64xf32>
    %225 = vector.extract_strided_slice %223 {offsets = [0, 0], sizes = [4, 64], strides = [1, 1]} : vector<4x192xf32> to vector<4x64xf32>
    %226 = arith.addf %224, %225 : vector<4x64xf32>
    %227 = arith.negf %226 : vector<4x64xf32>
    %228 = math.exp %227 : vector<4x64xf32>
    %cst_48 = arith.constant 1.000000e+00 : f32
    %229 = vector.broadcast %cst_48 : f32 to vector<4x64xf32>
    %230 = arith.addf %229, %228 : vector<4x64xf32>
    %231 = arith.divf %229, %230 : vector<4x64xf32>
    %232 = vector.extract_strided_slice %222 {offsets = [0, 64], sizes = [4, 64], strides = [1, 1]} : vector<4x192xf32> to vector<4x64xf32>
    %233 = vector.extract_strided_slice %223 {offsets = [0, 64], sizes = [4, 64], strides = [1, 1]} : vector<4x192xf32> to vector<4x64xf32>
    %234 = arith.addf %232, %233 : vector<4x64xf32>
    %235 = arith.negf %234 : vector<4x64xf32>
    %236 = math.exp %235 : vector<4x64xf32>
    %cst_49 = arith.constant 1.000000e+00 : f32
    %237 = vector.broadcast %cst_49 : f32 to vector<4x64xf32>
    %238 = arith.addf %237, %236 : vector<4x64xf32>
    %239 = arith.divf %237, %238 : vector<4x64xf32>
    %240 = vector.extract_strided_slice %222 {offsets = [0, 128], sizes = [4, 64], strides = [1, 1]} : vector<4x192xf32> to vector<4x64xf32>
    %241 = vector.extract_strided_slice %223 {offsets = [0, 128], sizes = [4, 64], strides = [1, 1]} : vector<4x192xf32> to vector<4x64xf32>
    %242 = arith.addf %241, %10 : vector<4x64xf32>
    %243 = arith.mulf %231, %242 : vector<4x64xf32>
    %244 = arith.addf %240, %243 : vector<4x64xf32>
    %245 = math.tanh %244 : vector<4x64xf32>
    %246 = arith.subf %213, %245 : vector<4x64xf32>
    %247 = arith.mulf %239, %246 : vector<4x64xf32>
    %248 = arith.addf %245, %247 : vector<4x64xf32>
    %249 = vector.extract_strided_slice %248 {offsets = [0, 0], sizes = [2, 32], strides = [1, 1]} : vector<4x64xf32> to vector<2x32xf32>
    %250 = vector.extract_strided_slice %248 {offsets = [2, 32], sizes = [2, 32], strides = [1, 1]} : vector<4x64xf32> to vector<2x32xf32>
    %251 = arith.subf %249, %250 : vector<2x32xf32>
    %252 = vector.extract_strided_slice %248 {offsets = [2, 0], sizes = [2, 32], strides = [1, 1]} : vector<4x64xf32> to vector<2x32xf32>
    %253 = vector.extract_strided_slice %248 {offsets = [0, 32], sizes = [2, 32], strides = [1, 1]} : vector<4x64xf32> to vector<2x32xf32>
    %254 = arith.addf %252, %253 : vector<2x32xf32>
    %255 = tpu.concatenate %251, %254 in 1 : vector<2x32xf32>, vector<2x32xf32> -> vector<2x64xf32>
    %c12_50 = arith.constant 12 : index
    %c0_51 = arith.constant 0 : index
    %256 = vector.load %arg9[%c12_50, %c0_51] : memref<16x64xf32, #tpu.memory_space<vmem>>, vector<2x64xf32>
    tpu.vector_store %arg9[%c12_50, %c0_51], %255 {strides = array<i32>} : memref<16x64xf32, #tpu.memory_space<vmem>>, vector<2x64xf32>,
    %c28 = arith.constant 28 : index
    %c0_52 = arith.constant 0 : index
    %257 = vector.load %arg8[%c28, %c0_52] : memref<32x192xf32, #tpu.memory_space<vmem>>, vector<4x192xf32>
    %cst_53 = arith.constant dense<0.000000e+00> : vector<4x192xf32>
    %258 = tpu.matmul %248, %7, %cst_53 {dimension_numbers = #tpu.dot_dimension_numbers<[1], [0], [0], [1], [0, 0, 1, 1], [], []>} : vector<4x64xf32>, vector<64x192xf32>, vector<4x192xf32> -> vector<4x192xf32>
    %259 = vector.extract_strided_slice %257 {offsets = [0, 0], sizes = [4, 64], strides = [1, 1]} : vector<4x192xf32> to vector<4x64xf32>
    %260 = vector.extract_strided_slice %258 {offsets = [0, 0], sizes = [4, 64], strides = [1, 1]} : vector<4x192xf32> to vector<4x64xf32>
    %261 = arith.addf %259, %260 : vector<4x64xf32>
    %262 = arith.negf %261 : vector<4x64xf32>
    %263 = math.exp %262 : vector<4x64xf32>
    %cst_54 = arith.constant 1.000000e+00 : f32
    %264 = vector.broadcast %cst_54 : f32 to vector<4x64xf32>
    %265 = arith.addf %264, %263 : vector<4x64xf32>
    %266 = arith.divf %264, %265 : vector<4x64xf32>
    %267 = vector.extract_strided_slice %257 {offsets = [0, 64], sizes = [4, 64], strides = [1, 1]} : vector<4x192xf32> to vector<4x64xf32>
    %268 = vector.extract_strided_slice %258 {offsets = [0, 64], sizes = [4, 64], strides = [1, 1]} : vector<4x192xf32> to vector<4x64xf32>
    %269 = arith.addf %267, %268 : vector<4x64xf32>
    %270 = arith.negf %269 : vector<4x64xf32>
    %271 = math.exp %270 : vector<4x64xf32>
    %cst_55 = arith.constant 1.000000e+00 : f32
    %272 = vector.broadcast %cst_55 : f32 to vector<4x64xf32>
    %273 = arith.addf %272, %271 : vector<4x64xf32>
    %274 = arith.divf %272, %273 : vector<4x64xf32>
    %275 = vector.extract_strided_slice %257 {offsets = [0, 128], sizes = [4, 64], strides = [1, 1]} : vector<4x192xf32> to vector<4x64xf32>
    %276 = vector.extract_strided_slice %258 {offsets = [0, 128], sizes = [4, 64], strides = [1, 1]} : vector<4x192xf32> to vector<4x64xf32>
    %277 = arith.addf %276, %10 : vector<4x64xf32>
    %278 = arith.mulf %266, %277 : vector<4x64xf32>
    %279 = arith.addf %275, %278 : vector<4x64xf32>
    %280 = math.tanh %279 : vector<4x64xf32>
    %281 = arith.subf %248, %280 : vector<4x64xf32>
    %282 = arith.mulf %274, %281 : vector<4x64xf32>
    %283 = arith.addf %280, %282 : vector<4x64xf32>
    %284 = vector.extract_strided_slice %283 {offsets = [0, 0], sizes = [2, 32], strides = [1, 1]} : vector<4x64xf32> to vector<2x32xf32>
    %285 = vector.extract_strided_slice %283 {offsets = [2, 32], sizes = [2, 32], strides = [1, 1]} : vector<4x64xf32> to vector<2x32xf32>
    %286 = arith.subf %284, %285 : vector<2x32xf32>
    %287 = vector.extract_strided_slice %283 {offsets = [2, 0], sizes = [2, 32], strides = [1, 1]} : vector<4x64xf32> to vector<2x32xf32>
    %288 = vector.extract_strided_slice %283 {offsets = [0, 32], sizes = [2, 32], strides = [1, 1]} : vector<4x64xf32> to vector<2x32xf32>
    %289 = arith.addf %287, %288 : vector<2x32xf32>
    %290 = tpu.concatenate %286, %289 in 1 : vector<2x32xf32>, vector<2x32xf32> -> vector<2x64xf32>
    %c14 = arith.constant 14 : index
    %c0_56 = arith.constant 0 : index
    %291 = vector.load %arg9[%c14, %c0_56] : memref<16x64xf32, #tpu.memory_space<vmem>>, vector<2x64xf32>
    tpu.vector_store %arg9[%c14, %c0_56], %290 {strides = array<i32>} : memref<16x64xf32, #tpu.memory_space<vmem>>, vector<2x64xf32>,
    %c0_57 = arith.constant 0 : index
    %c0_58 = arith.constant 0 : index
    %292 = vector.load %arg9[%c0_57, %c0_58] : memref<16x64xf32, #tpu.memory_space<vmem>>, vector<16x64xf32>
    %c0_59 = arith.constant 0 : index
    %c0_60 = arith.constant 0 : index
    %293 = vector.load %arg5[%c0_59, %c0_60] : memref<64x32xf32, #tpu.memory_space<vmem>>, vector<64x32xf32>
    %cst_61 = arith.constant dense<0.000000e+00> : vector<16x32xf32>
    %294 = tpu.matmul %292, %293, %cst_61 {dimension_numbers = #tpu.dot_dimension_numbers<[1], [0], [0], [1], [0, 0, 1, 1], [], []>} : vector<16x64xf32>, vector<64x32xf32>, vector<16x32xf32> -> vector<16x32xf32>
    %c0_62 = arith.constant 0 : index
    %c0_63 = arith.constant 0 : index
    %295 = vector.load %arg6[%c0_62, %c0_63] : memref<1x32xf32, #tpu.memory_space<vmem>>, vector<1x32xf32>
    %296 = vector.broadcast %295 : vector<1x32xf32> to vector<16x32xf32>
    %297 = arith.addf %294, %296 : vector<16x32xf32>
    %298 = math.tanh %297 : vector<16x32xf32>
    %c0_64 = arith.constant 0 : index
    %c0_65 = arith.constant 0 : index
    %299 = vector.load %arg7[%c0_64, %c0_65] : memref<16x32xf32, #tpu.memory_space<vmem>>, vector<16x32xf32>
    tpu.vector_store %arg7[%c0_64, %c0_65], %298 {strides = array<i32>} : memref<16x32xf32, #tpu.memory_space<vmem>>, vector<16x32xf32>,
    return
  }
}

</mosaic_0001>

<bundles_post_ra>
// kernel: _lambda_.1
= control target key start
LH: loop header
LB: loop body
LE: loop exit
PB: predicated region body
PF: predicated region fallthrough
CT: control target
= control target key end

     0   :  { %12 = vsyncpa [#allocation5], 0  ;;  %s2012_s0 = inlined_call_operand.vmem [shape: f32[32,16], index: 0, kind: input, shape index: {}]   ;;  %s2013_s1 = inlined_call_operand.vmem [shape: f32[16,192], index: 1, kind: input, shape index: {}]   ;;  %s2014_s2 = inlined_call_operand.vmem [shape: f32[64,192], index: 2, kind: input, shape index: {}]   ;;  %s2015_s3 = inlined_call_operand.vmem [shape: f32[1,192], index: 3, kind: input, shape index: {}]   ;;  %s2016_s4 = inlined_call_operand.hbm [shape: f32[1,64], index: 4, kind: input, shape index: {}]   ;;  %s2017_s5 = inlined_call_operand.vmem [shape: f32[64,32], index: 5, kind: input, shape index: {}]   ;;  %s2018_s6 = inlined_call_operand.hbm [shape: f32[1,32], index: 6, kind: input, shape index: {}]   ;;  %s2019_s7 = inlined_call_operand.vmem [shape: f32[16,32], index: 7, kind: output, shape index: {}]  }
   0x1   :  { %13 = vsyncpa [#allocation7], 0  ;;  %s1597_s24 = smov [#allocation4]   ;;  %s1598_s26 = smov [#allocation6]  }
   0x2   :  { %s28_s25 = sshll.u32 %s1597_s24, 4  ;;  %s40_s27 = sshll.u32 %s1598_s26, 4  ;;  %s29_s25 = int_to_ptr.vmem [resolvable:$true] %s28_s25  ;;  %s41_s27 = int_to_ptr.vmem [resolvable:$true] %s40_s27 }
   0x3   :  { %s1549_s30 = scalar_lea.hbm %s2016_s4, 16 }
   0x4   :  { %p1550_p0 = scmp.ne.s32.totalorder %s2016_s4, %s1549_s30  ;;  %p1553_p1 = scmp.lt.u32.totalorder %s1549_s30, %s2016_s4 }
   0x6   :  { %p1555_p2 = pnand %p1553_p1, %p1550_p0 }
   0x8   :  { %1558 = shalt.err (!%p1555_p2)
}
   0x9   :  { %s1559_s12 = scalar_lea.vmem %s29_s25, 16  ;;  %s1563_s13 = scalar_lea.vmem %s29_s25, 32 }
   0xa   :  { %p1560_p3 = scmp.ne.s32.totalorder %s29_s25, %s1559_s12  ;;  %p1564_p4 = scmp.lt.s32.totalorder %s29_s25, %s29_s25 }
   0xb   :  { %p1565_p5 = scmp.lt.s32.totalorder %s1563_s13, %s1559_s12 }
   0xd   :  { %p1566_p6 = por %p1565_p5, %p1564_p4 }
   0xf   :  { %p1567_p7 = pnand %p1566_p6, %p1560_p3 }
  0x11   :  { %1570 = shalt.err (!%p1567_p7)
}
  0x12   :  { %31 = dma.hbm_to_vmem [thread:$0]  %s2016_s4, 16, %s29_s25, [#allocation5]  }
  0x13   :  { %s1571_s18 = scalar_lea.hbm %s2018_s6, 16 }
  0x14   :  { %p1572_p8 = scmp.ne.s32.totalorder %s2018_s6, %s1571_s18  ;;  %p1575_p9 = scmp.lt.u32.totalorder %s1571_s18, %s2018_s6 }
  0x16   :  { %p1577_p10 = pnand %p1575_p9, %p1572_p8 }
  0x18   :  { %1580 = shalt.err (!%p1577_p10)
}
  0x19   :  { %s1581_s23 = scalar_lea.vmem %s41_s27, 16  ;;  %s1585_s24 = scalar_lea.vmem %s41_s27, 32 }
  0x1a   :  { %p1582_p11 = scmp.ne.s32.totalorder %s41_s27, %s1581_s23  ;;  %p1586_p12 = scmp.lt.s32.totalorder %s41_s27, %s41_s27 }
  0x1b   :  { %p1587_p13 = scmp.lt.s32.totalorder %s1585_s24, %s1581_s23 }
  0x1d   :  { %p1588_p0 = por %p1587_p13, %p1586_p12 }
  0x1f   :  { %p1589_p1 = pnand %p1588_p0, %p1582_p11 }
  0x21   :  { %1592 = shalt.err (!%p1589_p1)
}
  0x22   :  { %43 = dma.hbm_to_vmem [thread:$0]  %s2018_s6, 16, %s41_s27, [#allocation7]  }
  0x23   :  { %1593 = dma.done.wait [#allocation5], 16  }
  0x24   :  { %1594 = vsyncadd [#allocation5], 4294967280 }
  0x25   :  { %1595 = dma.done.wait [#allocation7], 16  }
  0x26   :  { %1596 = vsyncadd [#allocation7], 4294967280  ;;  %v1599_v0 = vmov 0.0   ;;  %v182_v1 = vld [vmem:[%s2014_s2 + $0x8] sm:$0xff]  ;;  %v184_v2 = vld [vmem:[%s2014_s2 + $0x18] sm:$0xff]  ;;  %vm70_vm0 = vcmask 130048   ;;  %v60_v32 = vlaneseq }
  0x27   :  { %147 = vmatprep.mubr.f32.mxu0 %v1599_v0  ;;  %273 = vmatprep.mubr.f32.mxu1 %v1599_v0  ;;  %v55_v3 = vld [vmem:[%s2013_s1 + $0x8] sm:$0xff]  ;;  %v1678_v4 = vpack.c.bf16 %v184_v2, %v182_v1  ;;  %v57_v5 = vld [vmem:[%s2013_s1 + $0x18] sm:$0xff]  ;;  %v181_v6 = vld [vmem:[%s2014_s2] sm:$0xff]  ;;  %vm173_vm1 = vcmask 523264   ;;  %s1602_s24 = smov 32   ;;  %vm318_vm2 = vcmask 261120  }
  0x28   :  { %v183_v7 = vld [vmem:[%s2014_s2 + $0x10] sm:$0xff]  ;;  %v1343_v8 = vpack.c.bf16 %v57_v5, %v55_v3  ;;  %v54_v10 = vld [vmem:[%s2013_s1] sm:$0xff]  ;;  %v186_v12 = vld [vmem:[%s2014_s2 + $0x28] sm:$0xff]  ;;  %v61_v33 = vshrl.u32 %v60_v32, 7  ;;  %vm320_vm3 = vcmask 517120   ;;  %vm446_vm4 = vcmask 521220  }
  0x29   :  { %v1689_v9 = vpack.c.bf16 %v183_v7, %v181_v6  ;;  %v56_v11 = vld [vmem:[%s2013_s1 + $0x10] sm:$0xff]  ;;  %1348 = vmatprep.subr.bf16.mxu1 %v1678_v4  ;;  %v188_v14 = vld [vmem:[%s2014_s2 + $0x38] sm:$0xff]  ;;  %v185_v15 = vld [vmem:[%s2014_s2 + $0x20] sm:$0xff]  ;;  %s1600_s1 = smov 64  }
  0x2a   :  { %v1345_v13 = vpack.c.bf16 %v56_v11, %v54_v10  ;;  %1344 = vmatprep.subr.bf16.mxu0 %v1343_v8  ;;  %v1708_v16 = vpack.c.bf16 %v188_v14, %v186_v12  ;;  %v187_v17 = vld [vmem:[%s2014_s2 + $0x30] sm:$0xff]  ;;  %v190_v18 = vld [vmem:[%s2014_s2 + $0x48] sm:$0xff]  ;;  %v192_v19 = vld [vmem:[%s2014_s2 + $0x58] sm:$0xff]  ;;  %v62_v34 = vsub.s32 0, %v61_v33  ;;  %v66_v36 = vsub.s32 1, %v61_v33 }
  0x2b   :  { %1350 = vmatpush1.bf16.msra.mxu1 %v1689_v9  ;;  %v50_v20 = vld [vmem:[%s2012_s0] sm:$0xff]  ;;  %v1722_v21 = vpack.c.bf16 %v187_v17, %v185_v15  ;;  %v1724_v22 = vpack.c.bf16 %v192_v19, %v190_v18  ;;  %v191_v24 = vld [vmem:[%s2014_s2 + $0x50] sm:$0xff]  ;;  %v194_v25 = vld [vmem:[%s2014_s2 + $0x68] sm:$0xff] }
  0x2c   :  { %1346 = vmatpush1.bf16.msra.mxu0 %v1345_v13  ;;  %v189_v23 = vld [vmem:[%s2014_s2 + $0x40] sm:$0xff]  ;;  %1352 = vmatprep.subr.bf16.mxu1 %v1708_v16  ;;  %v196_v26 = vld [vmem:[%s2014_s2 + $0x78] sm:$0xff]  ;;  %v195_v30 = vld [vmem:[%s2014_s2 + $0x70] sm:$0xff] }
  0x2d   :  { %1364 = vmatprep.subr.bf16.mxu0 %v1678_v4  ;;  %v1742_v27 = vpack.c.bf16 %v191_v24, %v189_v23  ;;  %v1745_v28 = vpack.c.bf16 %v196_v26, %v194_v25  ;;  %v193_v29 = vld [vmem:[%s2014_s2 + $0x60] sm:$0xff]  ;;  %v1782_v50 = vld [vmem:[#allocation4] ss:$0 sm:$0xff]  ;;  %v51_v56 = vld [vmem:[%s2012_s0 + $0x8] sm:$0xff] }
  0x2e   :  { %v1757_v31 = vpack.c.bf16 %v195_v30, %v193_v29  ;;  %v58_v35 = vld [vmem:[%s2015_s3] sm:$0x3]  ;;  %v52_v57 = vld [vmem:[%s2012_s0 + $0x10] sm:$0xff]  ;;  %v53_v58 = vld [vmem:[%s2012_s0 + $0x18] sm:$0xff]  ;;  %s1601_s0 = smov 96  }
  0x2f   :  { %1291 = vmatmul.mubr.msk.f32.vlgmr.msra.gmra.mrb[0].mxu0 %vm70_vm0, %v50_v20  ;;  %1354 = vmatpush1.bf16.msra.mxu1 %v1722_v21  ;;  %v63_v37 = vrot.slane %v58_v35, %v62_v34  ;;  %v67_v38 = vrot.slane %v58_v35, %v66_v36 }
  0x30   :  { %1356 = vmatprep.subr.bf16.mxu1 %v1724_v22  ;;  %1366 = vmatpush1.bf16.msra.mxu0 %v1689_v9 }
  0x31   :  { %153 = vmatprep.mubr.f32.mxu0 %v1599_v0  ;;  %1368 = vmatprep.subr.bf16.mxu0 %v1708_v16 }
  0x33   :  { %1358 = vmatpush1.bf16.msra.mxu1 %v1742_v27  ;;  %1292 = vmatmul.mubr.msk.f32.gmra.mrb[2].mxu0 %vm70_vm0, %v51_v56 }
  0x34   :  { %1360 = vmatprep.subr.bf16.mxu1 %v1745_v28  ;;  %1370 = vmatpush1.bf16.msra.mxu0 %v1722_v21 }
  0x35   :  { %1372 = vmatprep.subr.bf16.mxu0 %v1724_v22  ;;  %159 = vmatprep.mubr.f32.mxu0 %v1599_v0 }
  0x37   :  { %1362 = vmatpush1.bf16.msra.mxu1 %v1757_v31  ;;  %1293 = vmatmul.mubr.msk.f32.gmra.mrb[4].mxu0 %vm70_vm0, %v52_v57 }
  0x38   :  { %1374 = vmatpush1.bf16.msra.mxu0 %v1742_v27  ;;  %1380 = vmatprep.subr.bf16.mxu1 %v1678_v4 }
  0x39   :  { %1376 = vmatprep.subr.bf16.mxu0 %v1745_v28  ;;  %165 = vmatprep.mubr.f32.mxu0 %v1599_v0 }
  0x3a   :  { %274 = vmatmul.mubr.f32.vlgmr.msra.gmra.mrb[0].mxu1 %v1599_v0 }
  0x3b   :  { %1382 = vmatpush1.bf16.msra.mxu1 %v1689_v9  ;;  %517 = vmatprep.mubr.f32.mxu1 %v1599_v0 }
  0x3c   :  { %1378 = vmatpush1.bf16.msra.mxu0 %v1757_v31  ;;  %1384 = vmatprep.subr.bf16.mxu1 %v1708_v16 }
  0x3d   :  { %1396 = vmatprep.subr.bf16.mxu0 %v1678_v4  ;;  %1294 = vmatmul.mubr.msk.f32.gmra.mrb[6].mxu0 %vm70_vm0, %v53_v58 }
  0x3e   :  { %390 = vmatprep.mubr.f32.mxu0 %v1599_v0 }
  0x3f   :  { %1386 = vmatpush1.bf16.msra.mxu1 %v1722_v21 }
  0x40   :  { %1388 = vmatprep.subr.bf16.mxu1 %v1724_v22 }
  0x43   :  { %1390 = vmatpush1.bf16.msra.mxu1 %v1742_v27 }
  0x44   :  { %1392 = vmatprep.subr.bf16.mxu1 %v1745_v28 }
  0x47   :  { %1394 = vmatpush1.bf16.msra.mxu1 %v1757_v31 }
  0x48   :  { %1412 = vmatprep.subr.bf16.mxu1 %v1678_v4 }
 0x102   :  { %v149_v39 = vpop.f32.mrb[0].mxu0 }
 0x103   :  { %v150_v40 = vadd.f32 %v149_v39, %v63_v37  ;;  %v151_v41 = vpop.f32.mrb[1].mxu0 }
 0x104   :  { %v152_v42 = vadd.f32 %v151_v41, %v67_v38 }
 0x105   :  { %172 = vst [vmem:[#allocation2] sm:$0xff] %v150_v40 }
 0x106   :  { %174 = vst.msk [vmem:[#allocation2 + $0x8] sm:$0xff] %vm173_vm1, %v152_v42  ;;  %v155_v63 = vpop.f32.mrb[2].mxu0 }
 0x107   :  { %v156_v1 = vadd.f32 %v155_v63, %v63_v37  ;;  %v157_v2 = vpop.f32.mrb[3].mxu0 }
 0x108   :  { %v158_v3 = vadd.f32 %v157_v2, %v67_v38 }
 0x109   :  { %175 = vst [vmem:[#allocation2 + $0x10] sm:$0xff] %v156_v1 }
 0x10a   :  { %176 = vst.msk [vmem:[#allocation2 + $0x18] sm:$0xff] %vm173_vm1, %v158_v3  ;;  %v161_v5 = vpop.f32.mrb[4].mxu0 }
 0x10b   :  { %v162_v6 = vadd.f32 %v161_v5, %v63_v37  ;;  %v163_v7 = vpop.f32.mrb[5].mxu0 }
 0x10c   :  { %v204_v43 = vld [vmem:[#allocation2] sm:$0xf]  ;;  %v164_v8 = vadd.f32 %v163_v7, %v67_v38  ;;  %v322_v20 = vld [vmem:[#allocation2] sm:$0xf0] }
 0x10d   :  { %v275_v44 = vpop.f32.mrb[0].mxu1  ;;  %v205_v54 = vld [vmem:[#allocation2 + $0x8] sm:$0xf]  ;;  %177 = vst [vmem:[#allocation2 + $0x20] sm:$0xff] %v162_v6  ;;  %v323_v34 = vld [vmem:[#allocation2 + $0x8] sm:$0xf0] }
 0x10e   :  { %v280_v45 = vadd.f32 %v275_v44, %v204_v43  ;;  %v277_v46 = vpop.f32.mrb[1].mxu1  ;;  %178 = vst.msk [vmem:[#allocation2 + $0x28] sm:$0xff] %vm173_vm1, %v164_v8 }
 0x10f   :  { %v287_v51 = vadd.f32 %v1782_v50, %v277_v46 }
 0x110   :  { %v1296_v47 = vmul.f32 -1.442695, %v280_v45  ;;  %v167_v10 = vpop.f32.mrb[6].mxu0  ;;  %v448_v45 = vld [vmem:[#allocation2 + $0x10] sm:$0xf] }
 0x111   :  { %v168_v11 = vadd.f32 %v167_v10, %v63_v37  ;;  %v169_v12 = vpop.f32.mrb[7].mxu0  ;;  %v449_v56 = vld [vmem:[#allocation2 + $0x18] sm:$0xf]  ;;  %v568_v7 = vld [vmem:[#allocation2 + $0x10] sm:$0xf0] }
 0x112   :  { %1497 = vpow2.f32 %v1296_v47  ;;  %v170_v13 = vadd.f32 %v169_v12, %v67_v38 }
 0x113   :  { %179 = vst [vmem:[#allocation2 + $0x30] sm:$0xff] %v168_v11 }
 0x114   :  { %180 = vst.msk [vmem:[#allocation2 + $0x38] sm:$0xff] %vm173_vm1, %v170_v13 }
 0x11c   :  { %v1498_v48 = vpop.eup %1497 }
 0x11d   :  { %v284_v49 = vadd.f32 1.0, %v1498_v48 }
 0x11f   :  { %1499 = vrcp.f32 %v284_v49 }
 0x129   :  { %v1500_v52 = vpop.eup %1499 }
 0x12a   :  { %v288_v53 = vmul.f32 %v1500_v52, %v287_v51 }
 0x12c   :  { %v289_v55 = vadd.f32 %v288_v53, %v205_v54 }
 0x12e   :  { %1501 = vtanh.f32 %v289_v55 }
 0x138   :  { %v1502_v59 = vpop.eup %1501 }
 0x139   :  { %v291_v60 = vsub.f32 0.0, %v1502_v59 }
 0x13b   :  { %293 = vrot.lane.b32.xlu0 %v291_v60, %s1600_s1 }
 0x1ad   :  { %v294_v61 = vpop.permute.xlu0 %293 }
 0x1ae   :  { %v296_v62 = vmul.f32 %v1500_v52, %v294_v61 }
 0x1b0   :  { %298 = vrot.lane.b32.xlu0 %v296_v62, %s1600_s1 }
 0x222   :  { %v299_v14 = vpop.permute.xlu0 %298 }
 0x223   :  { %v1805_v15 = vadd.f32 %v1502_v59, %v299_v14 }
 0x225   :  { %1297 = vmatmul.mubr.msk.f32.vlgmr.msra.gmra.mrb[8].mxu0 %vm173_vm1, %v1805_v15 }
 0x226   :  { %1398 = vmatpush1.bf16.msra.mxu0 %v1689_v9  ;;  %636 = vmatprep.mubr.f32.mxu0 %v1599_v0 }
 0x227   :  { %1400 = vmatprep.subr.bf16.mxu0 %v1708_v16 }
 0x22a   :  { %1402 = vmatpush1.bf16.msra.mxu0 %v1722_v21 }
 0x22b   :  { %1404 = vmatprep.subr.bf16.mxu0 %v1724_v22 }
 0x22e   :  { %1406 = vmatpush1.bf16.msra.mxu0 %v1742_v27 }
 0x22f   :  { %1408 = vmatprep.subr.bf16.mxu0 %v1745_v28 }
 0x232   :  { %1410 = vmatpush1.bf16.msra.mxu0 %v1757_v31 }
 0x233   :  { %1428 = vmatprep.subr.bf16.mxu0 %v1678_v4 }
 0x2f8   :  { %v392_v17 = vpop.f32.mrb[8].mxu0 }
 0x2f9   :  { %v398_v18 = vrot.slane %v392_v17, 4  ;;  %v394_v19 = vpop.f32.mrb[9].mxu0 }
 0x2fa   :  { %v407_v29 = vadd.f32 %v1782_v50, %v394_v19  ;;  %v569_v19 = vld [vmem:[#allocation2 + $0x18] sm:$0xf0] }
 0x2fb   :  { %v400_v23 = vadd.f32 %v398_v18, %v322_v20 }
 0x2fc   :  { %v409_v30 = vrot.slane %v407_v29, 4 }
 0x2fd   :  { %v1298_v24 = vmul.f32 -1.442695, %v400_v23 }
 0x2ff   :  { %1503 = vpow2.f32 %v1298_v24 }
 0x309   :  { %v1504_v25 = vpop.eup %1503 }
 0x30a   :  { %v404_v26 = vadd.f32 1.0, %v1504_v25 }
 0x30c   :  { %1505 = vrcp.f32 %v404_v26 }
 0x316   :  { %v1506_v32 = vpop.eup %1505 }
 0x317   :  { %v411_v33 = vmul.f32 %v1506_v32, %v409_v30 }
 0x319   :  { %v412_v35 = vadd.f32 %v411_v33, %v323_v34  ;;  %v693_v34 = vld [vmem:[#allocation2 + $0x20] sm:$0xf] }
 0x31b   :  { %1507 = vtanh.f32 %v412_v35 }
 0x325   :  { %v1508_v36 = vpop.eup %1507 }
 0x326   :  { %v415_v37 = vrot.slane %v1508_v36, 4 }
 0x328   :  { %v417_v38 = vsub.f32 %v1805_v15, %v415_v37 }
 0x32a   :  { %v419_v39 = vrot.slane %v417_v38, 4 }
 0x32c   :  { %420 = vrot.lane.b32.xlu1 %v419_v39, %s1600_s1 }
 0x39e   :  { %v421_v40 = vpop.permute.xlu1 %420 }
 0x39f   :  { %v423_v41 = vmul.f32 %v1506_v32, %v421_v40 }
 0x3a1   :  { %425 = vrot.lane.b32.xlu1 %v423_v41, %s1600_s1 }
 0x413   :  { %v426_v42 = vpop.permute.xlu1 %425 }
 0x414   :  { %v1822_v43 = vadd.f32 %v1508_v36, %v426_v42 }
 0x416   :  { %v450_v44 = vrot.slane %v1822_v43, 4 }
 0x418   :  { %1299 = vmatmul.mubr.msk.f32.vlgmr.msra.gmra.mrb[2].mxu1 %vm173_vm1, %v450_v44 }
 0x419   :  { %1414 = vmatpush1.bf16.msra.mxu1 %v1689_v9  ;;  %762 = vmatprep.mubr.f32.mxu1 %v1599_v0 }
 0x41a   :  { %1416 = vmatprep.subr.bf16.mxu1 %v1708_v16 }
 0x41d   :  { %1418 = vmatpush1.bf16.msra.mxu1 %v1722_v21 }
 0x41e   :  { %1420 = vmatprep.subr.bf16.mxu1 %v1724_v22 }
 0x421   :  { %1422 = vmatpush1.bf16.msra.mxu1 %v1742_v27 }
 0x422   :  { %1424 = vmatprep.subr.bf16.mxu1 %v1745_v28 }
 0x425   :  { %1426 = vmatpush1.bf16.msra.mxu1 %v1757_v31 }
 0x426   :  { %1444 = vmatprep.subr.bf16.mxu1 %v1678_v4 }
 0x4eb   :  { %v519_v46 = vpop.f32.mrb[2].mxu1 }
 0x4ec   :  { %v524_v47 = vadd.f32 %v519_v46, %v448_v45  ;;  %v521_v48 = vpop.f32.mrb[3].mxu1  ;;  %v694_v45 = vld [vmem:[#allocation2 + $0x28] sm:$0xf] }
 0x4ed   :  { %v531_v53 = vadd.f32 %v1782_v50, %v521_v48 }
 0x4ee   :  { %v1300_v49 = vmul.f32 -1.442695, %v524_v47 }
 0x4f0   :  { %1509 = vpow2.f32 %v1300_v49 }
 0x4fa   :  { %v1510_v51 = vpop.eup %1509 }
 0x4fb   :  { %v528_v52 = vadd.f32 1.0, %v1510_v51 }
 0x4fd   :  { %1511 = vrcp.f32 %v528_v52 }
 0x507   :  { %v1512_v54 = vpop.eup %1511 }
 0x508   :  { %v532_v55 = vmul.f32 %v1512_v54, %v531_v53 }
 0x50a   :  { %v533_v57 = vadd.f32 %v532_v55, %v449_v56 }
 0x50c   :  { %1513 = vtanh.f32 %v533_v57 }
 0x516   :  { %v1514_v58 = vpop.eup %1513 }
 0x517   :  { %v536_v59 = vrot.slane %v1514_v58, 4 }
 0x519   :  { %v538_v60 = vsub.f32 %v1822_v43, %v536_v59  ;;  %v813_v59 = vld [vmem:[#allocation2 + $0x20] sm:$0xf0] }
 0x51b   :  { %v540_v61 = vrot.slane %v538_v60, 4 }
 0x51d   :  { %541 = vrot.lane.b32.xlu0 %v540_v61, %s1600_s1 }
 0x58f   :  { %v542_v62 = vpop.permute.xlu0 %541 }
 0x590   :  { %v544_v63 = vmul.f32 %v1512_v54, %v542_v62 }
 0x592   :  { %546 = vrot.lane.b32.xlu1 %v544_v63, %s1600_s1 }
 0x604   :  { %v547_v1 = vpop.permute.xlu1 %546 }
 0x605   :  { %v1839_v2 = vadd.f32 %v1514_v58, %v547_v1 }
 0x607   :  { %1301 = vmatmul.mubr.msk.f32.vlgmr.msra.gmra.mrb[10].mxu0 %vm173_vm1, %v1839_v2 }
 0x608   :  { %1430 = vmatpush1.bf16.msra.mxu0 %v1689_v9  ;;  %881 = vmatprep.mubr.f32.mxu0 %v1599_v0 }
 0x609   :  { %1432 = vmatprep.subr.bf16.mxu0 %v1708_v16 }
 0x60c   :  { %1434 = vmatpush1.bf16.msra.mxu0 %v1722_v21 }
 0x60d   :  { %1436 = vmatprep.subr.bf16.mxu0 %v1724_v22 }
 0x610   :  { %1438 = vmatpush1.bf16.msra.mxu0 %v1742_v27 }
 0x611   :  { %1440 = vmatprep.subr.bf16.mxu0 %v1745_v28 }
 0x614   :  { %1442 = vmatpush1.bf16.msra.mxu0 %v1757_v31 }
 0x615   :  { %1460 = vmatprep.subr.bf16.mxu0 %v1678_v4 }
 0x6da   :  { %v638_v3 = vpop.f32.mrb[10].mxu0 }
 0x6db   :  { %v644_v5 = vrot.slane %v638_v3, 4  ;;  %v640_v6 = vpop.f32.mrb[11].mxu0 }
 0x6dc   :  { %v653_v13 = vadd.f32 %v1782_v50, %v640_v6 }
 0x6dd   :  { %v646_v8 = vadd.f32 %v644_v5, %v568_v7 }
 0x6de   :  { %v655_v14 = vrot.slane %v653_v13, 4 }
 0x6df   :  { %v1302_v10 = vmul.f32 -1.442695, %v646_v8 }
 0x6e1   :  { %1515 = vpow2.f32 %v1302_v10 }
 0x6eb   :  { %v1516_v11 = vpop.eup %1515 }
 0x6ec   :  { %v650_v12 = vadd.f32 1.0, %v1516_v11  ;;  %v938_v11 = vld [vmem:[#allocation2 + $0x30] sm:$0xf] }
 0x6ee   :  { %1517 = vrcp.f32 %v650_v12 }
 0x6f8   :  { %v1518_v17 = vpop.eup %1517 }
 0x6f9   :  { %v657_v18 = vmul.f32 %v1518_v17, %v655_v14 }
 0x6fb   :  { %v658_v20 = vadd.f32 %v657_v18, %v569_v19 }
 0x6fd   :  { %1519 = vtanh.f32 %v658_v20 }
 0x707   :  { %v1520_v23 = vpop.eup %1519 }
 0x708   :  { %v661_v4 = vrot.slane %v1520_v23, 4 }
 0x70a   :  { %v663_v24 = vsub.f32 %v1839_v2, %v661_v4 }
 0x70c   :  { %v665_v25 = vrot.slane %v663_v24, 4  ;;  %v939_v24 = vld [vmem:[#allocation2 + $0x38] sm:$0xf] }
 0x70e   :  { %666 = vrot.lane.b32.xlu0 %v665_v25, %s1600_s1 }
 0x780   :  { %v667_v26 = vpop.permute.xlu0 %666 }
 0x781   :  { %v669_v29 = vmul.f32 %v1518_v17, %v667_v26 }
 0x783   :  { %671 = vrot.lane.b32.xlu1 %v669_v29, %s1600_s1 }
 0x7f5   :  { %v672_v30 = vpop.permute.xlu1 %671 }
 0x7f6   :  { %v1856_v32 = vadd.f32 %v1520_v23, %v672_v30 }
 0x7f8   :  { %v695_v33 = vrot.slane %v1856_v32, 4 }
 0x7fa   :  { %1303 = vmatmul.mubr.msk.f32.vlgmr.msra.gmra.mrb[4].mxu1 %vm173_vm1, %v695_v33 }
 0x7fb   :  { %1446 = vmatpush1.bf16.msra.mxu1 %v1689_v9  ;;  %1007 = vmatprep.mubr.f32.mxu1 %v1599_v0 }
 0x7fc   :  { %1448 = vmatprep.subr.bf16.mxu1 %v1708_v16 }
 0x7ff   :  { %1450 = vmatpush1.bf16.msra.mxu1 %v1722_v21 }
 0x800   :  { %1452 = vmatprep.subr.bf16.mxu1 %v1724_v22 }
 0x803   :  { %1454 = vmatpush1.bf16.msra.mxu1 %v1742_v27 }
 0x804   :  { %1456 = vmatprep.subr.bf16.mxu1 %v1745_v28 }
 0x807   :  { %1458 = vmatpush1.bf16.msra.mxu1 %v1757_v31 }
 0x8cd   :  { %v764_v35 = vpop.f32.mrb[4].mxu1 }
 0x8ce   :  { %v769_v36 = vadd.f32 %v764_v35, %v693_v34  ;;  %v766_v37 = vpop.f32.mrb[5].mxu1 }
 0x8cf   :  { %v776_v41 = vadd.f32 %v1782_v50, %v766_v37 }
 0x8d0   :  { %v1304_v38 = vmul.f32 -1.442695, %v769_v36 }
 0x8d2   :  { %1521 = vpow2.f32 %v1304_v38 }
 0x8dc   :  { %v1522_v39 = vpop.eup %1521 }
 0x8dd   :  { %v773_v40 = vadd.f32 1.0, %v1522_v39 }
 0x8df   :  { %1523 = vrcp.f32 %v773_v40 }
 0x8e9   :  { %v1524_v42 = vpop.eup %1523 }
 0x8ea   :  { %v777_v44 = vmul.f32 %v1524_v42, %v776_v41  ;;  %v1058_v41 = vld [vmem:[#allocation2 + $0x30] sm:$0xf0] }
 0x8ec   :  { %v778_v46 = vadd.f32 %v777_v44, %v694_v45 }
 0x8ee   :  { %1525 = vtanh.f32 %v778_v46 }
 0x8f8   :  { %v1526_v47 = vpop.eup %1525 }
 0x8f9   :  { %v781_v48 = vrot.slane %v1526_v47, 4 }
 0x8fb   :  { %v783_v49 = vsub.f32 %v1856_v32, %v781_v48 }
 0x8fd   :  { %v785_v51 = vrot.slane %v783_v49, 4 }
 0x8ff   :  { %786 = vrot.lane.b32.xlu0 %v785_v51, %s1600_s1 }
 0x971   :  { %v787_v52 = vpop.permute.xlu0 %786 }
 0x972   :  { %v789_v53 = vmul.f32 %v1524_v42, %v787_v52  ;;  %v1059_v52 = vld [vmem:[#allocation2 + $0x38] sm:$0xf0] }
 0x974   :  { %791 = vrot.lane.b32.xlu1 %v789_v53, %s1600_s1 }
 0x9e6   :  { %v792_v54 = vpop.permute.xlu1 %791 }
 0x9e7   :  { %v1872_v55 = vadd.f32 %v1526_v47, %v792_v54 }
 0x9e9   :  { %1305 = vmatmul.mubr.msk.f32.vlgmr.msra.gmra.mrb[12].mxu0 %vm173_vm1, %v1872_v55 }
 0x9ea   :  { %1462 = vmatpush1.bf16.msra.mxu0 %v1689_v9  ;;  %1126 = vmatprep.mubr.f32.mxu0 %v1599_v0 }
 0x9eb   :  { %1464 = vmatprep.subr.bf16.mxu0 %v1708_v16 }
 0x9ee   :  { %1466 = vmatpush1.bf16.msra.mxu0 %v1722_v21 }
 0x9ef   :  { %1468 = vmatprep.subr.bf16.mxu0 %v1724_v22 }
 0x9f2   :  { %1470 = vmatpush1.bf16.msra.mxu0 %v1742_v27  ;;  %v814_v27 = vld [vmem:[#allocation2 + $0x28] sm:$0xf0] }
 0x9f3   :  { %1472 = vmatprep.subr.bf16.mxu0 %v1745_v28 }
 0x9f6   :  { %1474 = vmatpush1.bf16.msra.mxu0 %v1757_v31 }
 0xabc   :  { %v883_v56 = vpop.f32.mrb[12].mxu0 }
 0xabd   :  { %v889_v57 = vrot.slane %v883_v56, 4  ;;  %v885_v58 = vpop.f32.mrb[13].mxu0 }
 0xabe   :  { %v898_v16 = vadd.f32 %v1782_v50, %v885_v58 }
 0xabf   :  { %v891_v60 = vadd.f32 %v889_v57, %v813_v59  ;;  %v308_v59 = vrot.slane %v1805_v15, 6 }
 0xac0   :  { %v900_v21 = vrot.slane %v898_v16, 4  ;;  %v796_v16 = vrot.slane %v1872_v55, 2 }
 0xac1   :  { %v1306_v9 = vmul.f32 -1.442695, %v891_v60  ;;  %v801_v60 = vrot.slane %v1872_v55, 6 }
 0xac3   :  { %1527 = vpow2.f32 %v1306_v9 }
 0xacd   :  { %v1528_v0 = vpop.eup %1527 }
 0xace   :  { %v895_v61 = vadd.f32 1.0, %v1528_v0  ;;  %v303_v0 = vrot.slane %v1805_v15, 2 }
 0xad0   :  { %1529 = vrcp.f32 %v895_v61  ;;  %v551_v61 = vrot.slane %v1839_v2, 2 }
 0xada   :  { %v1530_v22 = vpop.eup %1529 }
 0xadb   :  { %v902_v62 = vmul.f32 %v1530_v22, %v900_v21 }
 0xadd   :  { %v903_v63 = vadd.f32 %v902_v62, %v814_v27 }
 0xadf   :  { %1531 = vtanh.f32 %v903_v63 }
 0xae9   :  { %v1532_v28 = vpop.eup %1531 }
 0xaea   :  { %v906_v31 = vrot.slane %v1532_v28, 4 }
 0xaec   :  { %v908_v1 = vsub.f32 %v1872_v55, %v906_v31 }
 0xaee   :  { %v910_v3 = vrot.slane %v908_v1, 4 }
 0xaf0   :  { %911 = vrot.lane.b32.xlu0 %v910_v3, %s1600_s1 }
 0xb62   :  { %v912_v5 = vpop.permute.xlu0 %911 }
 0xb63   :  { %v914_v6 = vmul.f32 %v1530_v22, %v912_v5  ;;  %v681_v5 = vrot.slane %v1856_v32, 6 }
 0xb65   :  { %916 = vrot.lane.b32.xlu1 %v914_v6, %s1600_s1 }
 0xbd7   :  { %v917_v7 = vpop.permute.xlu1 %916 }
 0xbd8   :  { %v1888_v8 = vadd.f32 %v1532_v28, %v917_v7  ;;  %v435_v28 = vrot.slane %v1822_v43, 6 }
 0xbda   :  { %v940_v10 = vrot.slane %v1888_v8, 4 }
 0xbdc   :  { %1307 = vmatmul.mubr.msk.f32.vlgmr.msra.gmra.mrb[6].mxu1 %vm173_vm1, %v940_v10 }
 0xcaf   :  { %v1009_v12 = vpop.f32.mrb[6].mxu1 }
 0xcb0   :  { %v1014_v13 = vadd.f32 %v1009_v12, %v938_v11  ;;  %v1011_v14 = vpop.f32.mrb[7].mxu1  ;;  %v926_v11 = vrot.slane %v1888_v8, 6 }
 0xcb1   :  { %v1021_v20 = vadd.f32 %v1782_v50, %v1011_v14 }
 0xcb2   :  { %v1308_v17 = vmul.f32 -1.442695, %v1014_v13 }
 0xcb4   :  { %1533 = vpow2.f32 %v1308_v17 }
 0xcbe   :  { %v1534_v18 = vpop.eup %1533 }
 0xcbf   :  { %v1018_v19 = vadd.f32 1.0, %v1534_v18 }
 0xcc1   :  { %1535 = vrcp.f32 %v1018_v19 }
 0xccb   :  { %v1536_v23 = vpop.eup %1535 }
 0xccc   :  { %v1022_v4 = vmul.f32 %v1536_v23, %v1021_v20 }
 0xcce   :  { %v1023_v25 = vadd.f32 %v1022_v4, %v939_v24 }
 0xcd0   :  { %1537 = vtanh.f32 %v1023_v25 }
 0xcda   :  { %v1538_v26 = vpop.eup %1537 }
 0xcdb   :  { %v1026_v29 = vrot.slane %v1538_v26, 4 }
 0xcdd   :  { %v1028_v30 = vsub.f32 %v1888_v8, %v1026_v29 }
 0xcdf   :  { %v1030_v33 = vrot.slane %v1028_v30, 4 }
 0xce1   :  { %1031 = vrot.lane.b32.xlu0 %v1030_v33, %s1600_s1  ;;  %v430_v33 = vrot.slane %v1822_v43, 2 }
 0xd53   :  { %v1032_v34 = vpop.permute.xlu0 %1031 }
 0xd54   :  { %v1034_v35 = vmul.f32 %v1536_v23, %v1032_v34 }
 0xd56   :  { %1036 = vrot.lane.b32.xlu1 %v1034_v35, %s1600_s1 }
 0xdc8   :  { %v1037_v36 = vpop.permute.xlu1 %1036 }
 0xdc9   :  { %v1896_v37 = vadd.f32 %v1538_v26, %v1037_v36 }
 0xdcb   :  { %1309 = vmatmul.mubr.msk.f32.vlgmr.msra.gmra.mrb[14].mxu0 %vm173_vm1, %v1896_v37  ;;  %v1046_v9 = vrot.slane %v1896_v37, 6  ;;  %v1041_v21 = vrot.slane %v1896_v37, 2 }
 0xe9e   :  { %v1128_v38 = vpop.f32.mrb[14].mxu0 }
 0xe9f   :  { %v1134_v39 = vrot.slane %v1128_v38, 4  ;;  %v1130_v40 = vpop.f32.mrb[15].mxu0 }
 0xea0   :  { %v1143_v47 = vadd.f32 %v1782_v50, %v1130_v40  ;;  %v556_v50 = vrot.slane %v1839_v2, 6 }
 0xea1   :  { %v1136_v42 = vadd.f32 %v1134_v39, %v1058_v41 }
 0xea2   :  { %v1145_v48 = vrot.slane %v1143_v47, 4 }
 0xea3   :  { %v1310_v44 = vmul.f32 -1.442695, %v1136_v42 }
 0xea5   :  { %1539 = vpow2.f32 %v1310_v44 }
 0xeaf   :  { %v1540_v45 = vpop.eup %1539 }
 0xeb0   :  { %v1140_v46 = vadd.f32 1.0, %v1540_v45 }
 0xeb2   :  { %1541 = vrcp.f32 %v1140_v46 }
 0xebc   :  { %v1542_v49 = vpop.eup %1541 }
 0xebd   :  { %v1147_v51 = vmul.f32 %v1542_v49, %v1145_v48 }
 0xebf   :  { %v1148_v53 = vadd.f32 %v1147_v51, %v1059_v52  ;;  %v1185_v51 = vld [vmem:[%s2017_s5] sm:$0xff]  ;;  %v1187_v52 = vld [vmem:[%s2017_s5 + $0x10] sm:$0xff] }
 0xec1   :  { %1543 = vtanh.f32 %v1148_v53 }
 0xecb   :  { %v1544_v54 = vpop.eup %1543 }
 0xecc   :  { %v1151_v56 = vrot.slane %v1544_v54, 4 }
 0xece   :  { %v1153_v57 = vsub.f32 %v1896_v37, %v1151_v56 }
 0xed0   :  { %v1155_v58 = vrot.slane %v1153_v57, 4 }
 0xed2   :  { %1156 = vrot.lane.b32.xlu0 %v1155_v58, %s1600_s1 }
 0xed6   :  { %309 = vrot.lane.b32.xlu0 %v308_v59, %s1601_s0 }
 0xeda   :  { %557 = vrot.lane.b32.xlu0 %v556_v50, %s1601_s0 }
 0xede   :  { %802 = vrot.lane.b32.xlu0 %v801_v60, %s1601_s0  ;;  %v1189_v60 = vld [vmem:[%s2017_s5 + $0x20] sm:$0xff] }
 0xee2   :  { %1047 = vrot.lane.b32.xlu0 %v1046_v9, %s1601_s0  ;;  %v1190_v9 = vld [vmem:[%s2017_s5 + $0x28] sm:$0xff] }
 0xee6   :  { %304 = vrot.lane.b32.xlu0 %v303_v0, %s1601_s0  ;;  %v1483_v0 = vpack.c.bf16 %v1190_v9, %v1189_v60 }
 0xeea   :  { %552 = vrot.lane.b32.xlu0 %v551_v61, %s1601_s0  ;;  %v1191_v61 = vld [vmem:[%s2017_s5 + $0x30] sm:$0xff] }
 0xeee   :  { %797 = vrot.lane.b32.xlu0 %v796_v16, %s1601_s0  ;;  %v1192_v16 = vld [vmem:[%s2017_s5 + $0x38] sm:$0xff] }
 0xef2   :  { %1042 = vrot.lane.b32.xlu0 %v1041_v21, %s1601_s0  ;;  %v1487_v21 = vpack.c.bf16 %v1192_v16, %v1191_v61 }
 0xf44   :  { %v1157_v22 = vpop.permute.xlu0 %1156 }
 0xf45   :  { %v1159_v62 = vmul.f32 %v1542_v49, %v1157_v22 }
 0xf47   :  { %1161 = vrot.lane.b32.xlu1 %v1159_v62, %s1600_s1 }
 0xf48   :  { %v310_v27 = vpop.permute.xlu0 %309 }
 0xf49   :  { %v312_v63 = vadd.f32 %v310_v27, %v1805_v15 }
 0xf4b   :  { %v314_v31 = vrot.slane %v312_v63, 2  ;;  %436 = vrot.lane.b32.xlu1 %v435_v28, %s1601_s0 }
 0xf4c   :  { %v558_v1 = vpop.permute.xlu0 %557 }
 0xf4d   :  { %v560_v3 = vadd.f32 %v558_v1, %v1839_v2  ;;  %315 = vrot.lane.b32.xlu0 %v314_v31, %s1602_s24 }
 0xf4f   :  { %v562_v6 = vrot.slane %v560_v3, 2  ;;  %682 = vrot.lane.b32.xlu1 %v681_v5, %s1601_s0 }
 0xf50   :  { %v803_v7 = vpop.permute.xlu0 %802 }
 0xf51   :  { %v805_v10 = vadd.f32 %v803_v7, %v1872_v55  ;;  %563 = vrot.lane.b32.xlu0 %v562_v6, %s1602_s24 }
 0xf53   :  { %v807_v12 = vrot.slane %v805_v10, 2  ;;  %927 = vrot.lane.b32.xlu1 %v926_v11, %s1601_s0 }
 0xf54   :  { %v1048_v13 = vpop.permute.xlu0 %1047 }
 0xf55   :  { %v1050_v14 = vadd.f32 %v1048_v13, %v1896_v37  ;;  %808 = vrot.lane.b32.xlu0 %v807_v12, %s1602_s24 }
 0xf57   :  { %v1052_v17 = vrot.slane %v1050_v14, 2 }
 0xf58   :  { %v305_v18 = vpop.permute.xlu0 %304 }
 0xf59   :  { %1053 = vrot.lane.b32.xlu0 %v1052_v17, %s1602_s24  ;;  %v307_v26 = vsub.f32 %v1805_v15, %v305_v18  ;;  %v676_v15 = vrot.slane %v1856_v32, 2 }
 0xf5c   :  { %v553_v19 = vpop.permute.xlu0 %552 }
 0xf5d   :  { %v555_v35 = vsub.f32 %v1839_v2, %v553_v19  ;;  %v921_v2 = vrot.slane %v1888_v8, 2 }
 0xf60   :  { %v798_v20 = vpop.permute.xlu0 %797 }
 0xf61   :  { %v800_v39 = vsub.f32 %v1872_v55, %v798_v20 }
 0xf64   :  { %v1043_v24 = vpop.permute.xlu0 %1042 }
 0xf65   :  { %v1045_v45 = vsub.f32 %v1896_v37, %v1043_v24  ;;  %v1186_v37 = vld [vmem:[%s2017_s5 + $0x8] sm:$0xff] }
 0xf66   :  { %v1475_v53 = vpack.c.bf16 %v1186_v37, %v1185_v51 }
 0xf68   :  { %1476 = vmatprep.subr.bf16.mxu1 %v1475_v53 }
 0xf69   :  { %1478 = vmatpush3.bf16.msra.mxu1 %v1475_v53 }
 0xfb9   :  { %v1162_v23 = vpop.permute.xlu1 %1161 }
 0xfba   :  { %v1934_v4 = vadd.f32 %v1544_v54, %v1162_v23  ;;  %v1188_v54 = vld [vmem:[%s2017_s5 + $0x18] sm:$0xff] }
 0xfbb   :  { %v1479_v58 = vpack.c.bf16 %v1188_v54, %v1187_v52 }
 0xfbc   :  { %v1171_v25 = vrot.slane %v1934_v4, 6  ;;  %v1166_v50 = vrot.slane %v1934_v4, 2 }
 0xfbd   :  { %v437_v34 = vpop.permute.xlu1 %436  ;;  %1480 = vmatprep.subr.bf16.mxu1 %v1479_v58 }
 0xfbe   :  { %1172 = vrot.lane.b32.xlu1 %v1171_v25, %s1601_s0  ;;  %v439_v42 = vadd.f32 %v437_v34, %v1822_v43  ;;  %1482 = vmatpush3.bf16.msra.mxu1 %v1479_v58 }
 0xfbf   :  { %v316_v29 = vpop.permute.xlu0 %315  ;;  %1484 = vmatprep.subr.bf16.mxu1 %v1483_v0 }
 0xfc0   :  { %v319_v30 = vsel %vm318_vm2, %v307_v26, %v316_v29  ;;  %v441_v47 = vrot.slane %v439_v42, 2 }
 0xfc1   :  { %321 = vst.msk [vmem:[#allocation3] sm:$0x3] %vm320_vm3, %v319_v30  ;;  %v683_v40 = vpop.permute.xlu1 %682 }
 0xfc2   :  { %431 = vrot.lane.b32.xlu1 %v430_v33, %s1601_s0  ;;  %v685_v55 = vadd.f32 %v683_v40, %v1856_v32  ;;  %1486 = vmatpush3.bf16.msra.mxu1 %v1483_v0 }
 0xfc3   :  { %v564_v36 = vpop.permute.xlu0 %563  ;;  %1488 = vmatprep.subr.bf16.mxu1 %v1487_v21 }
 0xfc4   :  { %v566_v38 = vsel %vm318_vm2, %v555_v35, %v564_v36  ;;  %v687_v56 = vrot.slane %v685_v55, 2 }
 0xfc5   :  { %567 = vst.msk [vmem:[#allocation3 + $0x4] sm:$0x3] %vm320_vm3, %v566_v38  ;;  %v928_v49 = vpop.permute.xlu1 %927 }
 0xfc6   :  { %677 = vrot.lane.b32.xlu1 %v676_v15, %s1601_s0  ;;  %v930_v57 = vadd.f32 %v928_v49, %v1888_v8  ;;  %1490 = vmatpush3.bf16.msra.mxu1 %v1487_v21 }
 0xfc7   :  { %v809_v41 = vpop.permute.xlu0 %808 }
 0xfc8   :  { %v811_v44 = vsel %vm318_vm2, %v800_v39, %v809_v41  ;;  %v932_v59 = vrot.slane %v930_v57, 2 }
 0xfc9   :  { %812 = vst.msk [vmem:[#allocation3 + $0x8] sm:$0x3] %vm320_vm3, %v811_v44 }
 0xfca   :  { %922 = vrot.lane.b32.xlu1 %v921_v2, %s1601_s0 }
 0xfcb   :  { %v1054_v46 = vpop.permute.xlu0 %1053 }
 0xfcc   :  { %v1056_v48 = vsel %vm318_vm2, %v1045_v45, %v1054_v46 }
 0xfcd   :  { %1057 = vst.msk [vmem:[#allocation3 + $0xc] sm:$0x3] %vm320_vm3, %v1056_v48 }
 0xfce   :  { %442 = vrot.lane.b32.xlu1 %v441_v47, %s1602_s24 }
 0xfd2   :  { %688 = vrot.lane.b32.xlu1 %v687_v56, %s1602_s24 }
 0xfd6   :  { %933 = vrot.lane.b32.xlu1 %v932_v59, %s1602_s24 }
 0xfda   :  { %1167 = vrot.lane.b32.xlu1 %v1166_v50, %s1601_s0 }
0x1030   :  { %v1173_v22 = vpop.permute.xlu1 %1172 }
0x1031   :  { %v1175_v62 = vadd.f32 %v1173_v22, %v1934_v4 }
0x1033   :  { %v1177_v27 = vrot.slane %v1175_v62, 2 }
0x1034   :  { %v432_v63 = vpop.permute.xlu1 %431 }
0x1035   :  { %1178 = vrot.lane.b32.xlu1 %v1177_v27, %s1602_s24  ;;  %v434_v1 = vsub.f32 %v1822_v43, %v432_v63 }
0x1038   :  { %v678_v28 = vpop.permute.xlu1 %677 }
0x1039   :  { %v680_v6 = vsub.f32 %v1856_v32, %v678_v28 }
0x103c   :  { %v923_v31 = vpop.permute.xlu1 %922 }
0x103d   :  { %v925_v11 = vsub.f32 %v1888_v8, %v923_v31  ;;  %v1311_v8 = vld [vmem:[#allocation6] ss:$0 sm:$0xff] }
0x1040   :  { %v443_v3 = vpop.permute.xlu1 %442 }
0x1041   :  { %v445_v5 = vsel %vm318_vm2, %v434_v1, %v443_v3 }
0x1042   :  { %447 = vst.msk [vmem:[#allocation3 - $0x2] sm:$0x30] %vm446_vm4, %v445_v5 }
0x1044   :  { %v689_v7 = vpop.permute.xlu1 %688 }
0x1045   :  { %v691_v10 = vsel %vm318_vm2, %v680_v6, %v689_v7 }
0x1046   :  { %692 = vst.msk [vmem:[#allocation3 + $0x2] sm:$0x30] %vm446_vm4, %v691_v10 }
0x1048   :  { %v934_v12 = vpop.permute.xlu1 %933 }
0x1049   :  { %v936_v13 = vsel %vm318_vm2, %v925_v11, %v934_v12 }
0x104a   :  { %937 = vst.msk [vmem:[#allocation3 + $0x6] sm:$0x30] %vm446_vm4, %v936_v13 }
0x104c   :  { %v1168_v14 = vpop.permute.xlu1 %1167 }
0x104d   :  { %v1183_v43 = vld [vmem:[#allocation3] sm:$0xff]  ;;  %v1170_v17 = vsub.f32 %v1934_v4, %v1168_v14 }
0x104e   :  { %1340 = vmatprep.mubr.msk.f32.mxu1 %vm173_vm1, %v1183_v43 }
0x10a7   :  { %v1179_v18 = vpop.permute.xlu1 %1178 }
0x10a8   :  { %v1181_v32 = vsel %vm318_vm2, %v1170_v17, %v1179_v18 }
0x10a9   :  { %1182 = vst.msk [vmem:[#allocation3 + $0xa] sm:$0x30] %vm446_vm4, %v1181_v32 }
0x10b0   :  { %v1184_v19 = vld [vmem:[#allocation3 + $0x8] sm:$0xff] }
0x10b1   :  { %1341 = vmatmul.mubr.msk.f32.vlgmr.msra.gmra.mrb[8].mxu1 %vm173_vm1, %v1184_v19 }
0x1184   :  { %v1342_v20 = vpop.f32.mrb[8].mxu1 }
0x1185   :  { %v1278_v23 = vadd.f32 %v1342_v20, %v1311_v8  ;;  %v1272_v24 = vpop.f32.mrb[9].mxu1 }
0x1186   :  { %v1273_v25 = vadd.f32 %v1311_v8, %v1272_v24 }
0x1187   :  { %1545 = vtanh.f32 %v1278_v23 }
0x1188   :  { %1547 = vtanh.f32 %v1273_v25 }
0x1191   :  { %v1546_v26 = vpop.eup %1545 }
0x1192   :  { %v1548_v29 = vpop.eup %1547  ;;  %1284 = vst.msk [vmem:[%s2019_s7 + $0x8] sm:$0xff] %vm318_vm2, %v1546_v26 }
0x1193   :  { %1283 = vst.msk [vmem:[%s2019_s7] sm:$0xff] %vm318_vm2, %v1548_v29 }
0x1194   :  { %1289 = vsyncpa [#allocation5], 1 }
0x1195   :  { %1290 = vsyncpa [#allocation7], 1 }

</bundles_post_ra>
